<compile_context>
chip_gen: v6e
topology: v6e:2x2x1
jax: 0.10.0
libtpu: 0.0.40
codegen_flags: <defaults>
</compile_context>

<pallas_src>
import itertools
import numpy as np

import jax
import jax.numpy as jnp
from jax import lax
from jax.experimental import pallas as pl
from jax.experimental.pallas import tpu as pltpu

# ---- problem sizes (small, consistent with the module's forward) ----
L = 3            # num decoder layers
B = 2            # batch size
Q = 8            # num queries
C = 9            # num_classes (SetCriterion default)
T = 4            # targets per image (fixed / all valid)
LB = L * B
TQ = T * Q

# SetCriterion / HungarianMatcher coefficients (defaults)
COEF_CLASS, COEF_BOXES, COEF_GIOU = 2.0, 5.0, 2.0          # criterion
M_COEF_CLASS, M_COEF_BBOX, M_COEF_GIOU = 2.0, 5.0, 2.0     # matcher
ALPHA_FOCAL = 0.25                                         # gamma = 2.0 -> squaring
EPS = 1e-8

# ---- static permutation table: all P(Q, T) injective target->query maps ----
# PERM_QP[t*Q + q, p] = 1  iff permutation p assigns query q to target t.
_PERMS = np.asarray(list(itertools.permutations(range(Q), T)), dtype=np.int32)  # [NPERM, T]
NPERM = _PERMS.shape[0]                                                         # 1680
_pq = np.zeros((NPERM, T * Q), dtype=np.float32)
_pq[np.arange(NPERM)[:, None], np.arange(T)[None, :] * Q + _PERMS] = 1.0
PERM_QP = jnp.asarray(np.ascontiguousarray(_pq.T), dtype=jnp.bfloat16)   # [T*Q, NPERM]


# ---------------------------------------------------------------------------
# Fused kernel: matching cost -> exact assignment -> focal / L1 / GIoU sums.
#   logits_ref [LB, T*Q, C]  (logits tiled T times along the query axis)
#   labels_ref [LB, T*Q] i32 (gt class repeated Q times per target)
#   pbox_ref   [4, LB, T*Q]  (pred cx,cy,w,h tiled T times)
#   gbox_ref   [4, LB, T*Q]  (gt   cx,cy,w,h repeated Q times)
#   perm_ref   [T*Q, NPERM]  bf16 0/1 permutation table
#   out_ref    SMEM (3,)     [focal_sum, l1_sum, giou_loss_sum]
# ---------------------------------------------------------------------------
def criterion_kernel(logits_ref, labels_ref, pbox_ref, gbox_ref, perm_ref, out_ref):
    f32 = jnp.float32

    # ---- focal-style class terms on the (t, q)-tiled logits -----------------
    x = logits_ref[...].astype(f32)                       # [LB, TQ, C]
    prob = jax.nn.sigmoid(x)
    sp = jnp.log1p(jnp.exp(-jnp.abs(x)))                  # shared softplus(-|x|)
    neg_log_p = jnp.maximum(-x, 0.0) + sp                 # -log(sigmoid(x))
    neg_log_1mp = jnp.maximum(x, 0.0) + sp                # -log(1 - sigmoid(x))
    one_m_p = 1.0 - prob
    neg_c = (1.0 - ALPHA_FOCAL) * (prob * prob) * neg_log_1mp    # focal term, target = 0
    pos_c = ALPHA_FOCAL * (one_m_p * one_m_p) * neg_log_p        # focal term, target = 1
    cls_term = pos_c - neg_c                                     # [LB, TQ, C]

    # class cost at the gt class (== focal(target=1) - focal(target=0) there), flat (t,q)
    c_iota = lax.broadcasted_iota(jnp.int32, (LB, TQ, C), 2)
    gt_onehot = (c_iota == labels_ref[...][:, :, None]).astype(f32)   # [LB, TQ, C]
    cls_flat = jnp.sum(cls_term * gt_onehot, axis=-1)                 # [LB, TQ]

    # focal background term: every (query, class) cell with target = 0
    # (the tiled layout repeats each query T times; slice one copy)
    focal_bg = jnp.sum(neg_c[:, 0:Q, :])

    # ---- box costs, flat (t, q) layout --------------------------------------
    pcx, pcy, pw, ph = pbox_ref[0], pbox_ref[1], pbox_ref[2], pbox_ref[3]   # [LB, TQ]
    gcx, gcy, gw, gh = gbox_ref[0], gbox_ref[1], gbox_ref[2], gbox_ref[3]

    l1_flat = (jnp.abs(pcx - gcx) + jnp.abs(pcy - gcy)
               + jnp.abs(pw - gw) + jnp.abs(ph - gh))              # [LB, TQ]

    px1 = pcx - 0.5 * pw
    py1 = pcy - 0.5 * ph
    px2 = pcx + 0.5 * pw
    py2 = pcy + 0.5 * ph
    gx1 = gcx - 0.5 * gw
    gy1 = gcy - 0.5 * gh
    gx2 = gcx + 0.5 * gw
    gy2 = gcy + 0.5 * gh
    area_p = (px2 - px1) * (py2 - py1)
    area_g = (gx2 - gx1) * (gy2 - gy1)
    iw = jnp.maximum(jnp.minimum(px2, gx2) - jnp.maximum(px1, gx1), 0.0)
    ih = jnp.maximum(jnp.minimum(py2, gy2) - jnp.maximum(py1, gy1), 0.0)
    inter = iw * ih
    union = area_p + area_g - inter
    iou = inter / (union + EPS)
    ew = jnp.maximum(px2, gx2) - jnp.minimum(px1, gx1)
    eh = jnp.maximum(py2, gy2) - jnp.minimum(py1, gy1)
    area_e = ew * eh
    giou_flat = iou - (area_e - union) / (area_e + EPS)            # [LB, TQ]

    # ---- matching: ONE K = T*Q matmul over all P(Q, T) permutations ---------
    cost_flat = (M_COEF_BBOX * l1_flat + M_COEF_CLASS * cls_flat
                 - M_COEF_GIOU * giou_flat)                        # [LB, TQ]
    perm = perm_ref[...]                                           # [TQ, NPERM] bf16 0/1
    perm_costs = jnp.dot(cost_flat, perm.astype(f32),
                         preferred_element_type=f32)               # [LB, NPERM]

    # exact assignment: first minimizing permutation per (layer, image) row.
    # (iota/where/min tie-break kept instead of jnp.argmin: deterministic first-min
    #  and guaranteed to lower on all Mosaic versions.)
    min_cost = jnp.min(perm_costs, axis=-1, keepdims=True)         # [LB, 1]
    p_iota = lax.broadcasted_iota(jnp.int32, (LB, NPERM), 1)
    cand = jnp.where(perm_costs <= min_cost, p_iota, NPERM)
    best = jnp.min(cand, axis=-1, keepdims=True)                   # [LB, 1]
    sel = (p_iota == best).astype(jnp.bfloat16)                    # [LB, NPERM] one-hot

    # assignment mask in the same flat layout: a_flat[l, t*Q+q] = 1 iff target t -> query q
    # (NT dot against the same bf16 table; 0/1 x 0/1 is exact, accumulate in f32)
    a_flat = lax.dot_general(sel, perm,
                             dimension_numbers=(((1,), (1,)), ((), ())),
                             preferred_element_type=f32)           # [LB, TQ]

    # ---- losses over matched pairs: reuse the matching-cost columns ---------
    l1_sum = jnp.sum(a_flat * l1_flat)
    giou_loss_sum = jnp.sum(a_flat * (1.0 - giou_flat))
    focal_sum = focal_bg + jnp.sum(a_flat * cls_flat)

    out_ref[0] = focal_sum
    out_ref[1] = l1_sum
    out_ref[2] = giou_loss_sum


# ---------------------------------------------------------------------------
# SetCriterion.forward equivalent (fully jitted, single pallas_call).
# The wrapper pre-tiles pred/gt data into the flat (t, q) lane layout so the kernel
# needs no in-kernel reshape/concat/transpose (a few KB of extra DMA, fused by XLA).
# ---------------------------------------------------------------------------
def _set_criterion_forward(logit_all, boxes_all, gt_labels, gt_boxes):
    f32 = jnp.float32

    logits = logit_all.reshape(LB, Q, C).astype(f32)
    logits_flat = jnp.tile(logits, (1, T, 1))                          # [LB, TQ, C]

    pred = boxes_all.reshape(LB, Q, 4).astype(f32)
    pbox_flat = jnp.transpose(jnp.tile(pred, (1, T, 1)), (2, 0, 1))    # [4, LB, TQ]

    gtb = jnp.broadcast_to(gt_boxes[None].astype(f32),
                           (L, B, T, 4)).reshape(LB, T, 4)
    gbox_flat = jnp.transpose(jnp.repeat(gtb, Q, axis=1), (2, 0, 1))   # [4, LB, TQ]

    labels_lb = jnp.broadcast_to(gt_labels[None].astype(jnp.int32),
                                 (L, B, T)).reshape(LB, T)
    labels_flat = jnp.repeat(labels_lb, Q, axis=1)                     # [LB, TQ]

    sums = pl.pallas_call(
        criterion_kernel,
        out_shape=jax.ShapeDtypeStruct((3,), jnp.float32),
        in_specs=[pl.BlockSpec(memory_space=pltpu.VMEM)] * 5,
        out_specs=pl.BlockSpec(memory_space=pltpu.SMEM),
    )(logits_flat, labels_flat, pbox_flat, gbox_flat, PERM_QP)

    num_boxes = float(max(B * T, 1))   # sum of labels per image, world_size = 1
    # per-layer losses are sums / num_boxes; accumulated over layers then / L
    loss_class = sums[0] / num_boxes / L
    loss_boxes = sums[1] / num_boxes / L
    loss_giou = sums[2] / num_boxes / L
    loss = (COEF_CLASS * loss_class + COEF_BOXES * loss_boxes
            + COEF_GIOU * loss_giou).reshape(1)
    loss_dict = {"loss_class": loss_class, "loss_boxes": loss_boxes,
                 "loss_giou": loss_giou}
    return loss, loss_dict


set_criterion_forward = jax.jit(_set_criterion_forward)


if __name__ == "__main__":
    key = jax.random.PRNGKey(0)
    k1, k2, k3, k4 = jax.random.split(key, 4)

    logit_all = jax.random.normal(k1, (L, B, Q, C), dtype=jnp.float32)
    # predicted / gt boxes in valid (cx, cy, w, h) ranges
    pc = jax.random.uniform(k2, (L, B, Q, 2), minval=0.25, maxval=0.75)
    pwh = jax.random.uniform(k2, (L, B, Q, 2), minval=0.10, maxval=0.30)
    boxes_all = jnp.concatenate([pc, pwh], axis=-1).astype(jnp.float32)

    gt_labels = jax.random.randint(k3, (B, T), 0, C, dtype=jnp.int32)
    gc = jax.random.uniform(k4, (B, T, 2), minval=0.25, maxval=0.75)
    gwh = jax.random.uniform(k4, (B, T, 2), minval=0.10, maxval=0.30)
    gt_boxes = jnp.concatenate([gc, gwh], axis=-1).astype(jnp.float32)

    loss, loss_dict = set_criterion_forward(logit_all, boxes_all, gt_labels, gt_boxes)
    jax.block_until_ready(loss)
    for v in loss_dict.values():
        jax.block_until_ready(v)

    assert np.isfinite(np.asarray(loss)).all()
    assert all(np.isfinite(np.asarray(v)).all() for v in loss_dict.values())
    print("KERNEL_OK")
</pallas_src>

<mosaic_0001>
module attributes {stable_mosaic.version = 11 : i64} {
  func.func @criterion_kernel(%arg0: memref<6x32x9xf32, #tpu.memory_space<vmem>>, %arg1: memref<6x32xi32, #tpu.memory_space<vmem>>, %arg2: memref<4x6x32xf32, #tpu.memory_space<vmem>>, %arg3: memref<4x6x32xf32, #tpu.memory_space<vmem>>, %arg4: memref<32x1680xbf16, #tpu.memory_space<vmem>>, %arg5: memref<3xf32, #tpu.memory_space<smem>>) attributes {dimension_semantics = [], scalar_prefetch = 0 : i64, scratch_operands = 0 : i64, tpu.core_type = #tpu.core_type<tc>} {
    %c0 = arith.constant 0 : index
    %c0_0 = arith.constant 0 : index
    %c0_1 = arith.constant 0 : index
    %0 = vector.load %arg0[%c0, %c0_0, %c0_1] : memref<6x32x9xf32, #tpu.memory_space<vmem>>, vector<6x32x9xf32>
    %1 = arith.negf %0 : vector<6x32x9xf32>
    %2 = math.exp %1 : vector<6x32x9xf32>
    %cst = arith.constant 1.000000e+00 : f32
    %3 = vector.broadcast %cst : f32 to vector<6x32x9xf32>
    %4 = arith.addf %3, %2 : vector<6x32x9xf32>
    %5 = arith.divf %3, %4 : vector<6x32x9xf32>
    %6 = math.absf %0 : vector<6x32x9xf32>
    %cst_2 = arith.constant 0.000000e+00 : f32
    %7 = vector.broadcast %cst_2 : f32 to vector<6x32x9xf32>
    %8 = arith.subf %7, %6 : vector<6x32x9xf32>
    %9 = math.exp %8 : vector<6x32x9xf32>
    %10 = math.log1p %9 : vector<6x32x9xf32>
    %cst_3 = arith.constant 0.000000e+00 : f32
    %11 = vector.broadcast %cst_3 : f32 to vector<6x32x9xf32>
    %12 = arith.subf %11, %0 : vector<6x32x9xf32>
    %cst_4 = arith.constant 0.000000e+00 : f32
    %13 = vector.broadcast %cst_4 : f32 to vector<6x32x9xf32>
    %14 = arith.maximumf %12, %13 : vector<6x32x9xf32>
    %15 = arith.addf %14, %10 : vector<6x32x9xf32>
    %cst_5 = arith.constant 0.000000e+00 : f32
    %16 = vector.broadcast %cst_5 : f32 to vector<6x32x9xf32>
    %17 = arith.maximumf %0, %16 : vector<6x32x9xf32>
    %18 = arith.addf %17, %10 : vector<6x32x9xf32>
    %cst_6 = arith.constant 1.000000e+00 : f32
    %19 = vector.broadcast %cst_6 : f32 to vector<6x32x9xf32>
    %20 = arith.subf %19, %5 : vector<6x32x9xf32>
    %21 = arith.mulf %5, %5 : vector<6x32x9xf32>
    %cst_7 = arith.constant 7.500000e-01 : f32
    %22 = vector.broadcast %cst_7 : f32 to vector<6x32x9xf32>
    %23 = arith.mulf %22, %21 : vector<6x32x9xf32>
    %24 = arith.mulf %23, %18 : vector<6x32x9xf32>
    %25 = arith.mulf %20, %20 : vector<6x32x9xf32>
    %cst_8 = arith.constant 2.500000e-01 : f32
    %26 = vector.broadcast %cst_8 : f32 to vector<6x32x9xf32>
    %27 = arith.mulf %26, %25 : vector<6x32x9xf32>
    %28 = arith.mulf %27, %15 : vector<6x32x9xf32>
    %29 = arith.subf %28, %24 : vector<6x32x9xf32>
    %30 = tpu.iota {dimensions = array<i32: 2>} : vector<6x32x9xi32>
    %c0_9 = arith.constant 0 : index
    %c0_10 = arith.constant 0 : index
    %31 = vector.load %arg1[%c0_9, %c0_10] : memref<6x32xi32, #tpu.memory_space<vmem>>, vector<6x32xi32>
    %32 = vector.shape_cast %31 : vector<6x32xi32> to vector<6x32x1xi32>
    %33 = vector.broadcast %32 : vector<6x32x1xi32> to vector<6x32x9xi32>
    %34 = arith.cmpi eq, %30, %33 : vector<6x32x9xi32>
    %35 = arith.extui %34 : vector<6x32x9xi1> to vector<6x32x9xi32>
    %36 = arith.sitofp %35 : vector<6x32x9xi32> to vector<6x32x9xf32>
    %37 = arith.mulf %29, %36 : vector<6x32x9xf32>
    %cst_11 = arith.constant dense<0.000000e+00> : vector<6x32xf32>
    %38 = vector.multi_reduction <add>, %37, %cst_11 [2] : vector<6x32x9xf32> to vector<6x32xf32>
    %39 = vector.extract_strided_slice %24 {offsets = [0, 0, 0], sizes = [6, 8, 9], strides = [1, 1, 1]} : vector<6x32x9xf32> to vector<6x8x9xf32>
    %40 = vector.shape_cast %39 : vector<6x8x9xf32> to vector<1x6x8x9xf32>
    %cst_12 = arith.constant dense<0.000000e+00> : vector<1xf32>
    %41 = vector.multi_reduction <add>, %40, %cst_12 [1, 2, 3] : vector<1x6x8x9xf32> to vector<1xf32>
    %42 = vector.shape_cast %41 : vector<1xf32> to vector<1x1x1x1xf32>
    %43 = vector.extract %42[0, 0, 0, 0] : f32 from vector<1x1x1x1xf32>
    %c0_13 = arith.constant 0 : index
    %c0_14 = arith.constant 0 : index
    %c0_15 = arith.constant 0 : index
    %44 = vector.load %arg2[%c0_13, %c0_14, %c0_15] : memref<4x6x32xf32, #tpu.memory_space<vmem>>, vector<1x6x32xf32>
    %45 = vector.shape_cast %44 : vector<1x6x32xf32> to vector<6x32xf32>
    %c1 = arith.constant 1 : index
    %c0_16 = arith.constant 0 : index
    %c0_17 = arith.constant 0 : index
    %46 = vector.load %arg2[%c1, %c0_16, %c0_17] : memref<4x6x32xf32, #tpu.memory_space<vmem>>, vector<1x6x32xf32>
    %47 = vector.shape_cast %46 : vector<1x6x32xf32> to vector<6x32xf32>
    %c2 = arith.constant 2 : index
    %c0_18 = arith.constant 0 : index
    %c0_19 = arith.constant 0 : index
    %48 = vector.load %arg2[%c2, %c0_18, %c0_19] : memref<4x6x32xf32, #tpu.memory_space<vmem>>, vector<1x6x32xf32>
    %49 = vector.shape_cast %48 : vector<1x6x32xf32> to vector<6x32xf32>
    %c3 = arith.constant 3 : index
    %c0_20 = arith.constant 0 : index
    %c0_21 = arith.constant 0 : index
    %50 = vector.load %arg2[%c3, %c0_20, %c0_21] : memref<4x6x32xf32, #tpu.memory_space<vmem>>, vector<1x6x32xf32>
    %51 = vector.shape_cast %50 : vector<1x6x32xf32> to vector<6x32xf32>
    %c0_22 = arith.constant 0 : index
    %c0_23 = arith.constant 0 : index
    %c0_24 = arith.constant 0 : index
    %52 = vector.load %arg3[%c0_22, %c0_23, %c0_24] : memref<4x6x32xf32, #tpu.memory_space<vmem>>, vector<1x6x32xf32>
    %53 = vector.shape_cast %52 : vector<1x6x32xf32> to vector<6x32xf32>
    %c1_25 = arith.constant 1 : index
    %c0_26 = arith.constant 0 : index
    %c0_27 = arith.constant 0 : index
    %54 = vector.load %arg3[%c1_25, %c0_26, %c0_27] : memref<4x6x32xf32, #tpu.memory_space<vmem>>, vector<1x6x32xf32>
    %55 = vector.shape_cast %54 : vector<1x6x32xf32> to vector<6x32xf32>
    %c2_28 = arith.constant 2 : index
    %c0_29 = arith.constant 0 : index
    %c0_30 = arith.constant 0 : index
    %56 = vector.load %arg3[%c2_28, %c0_29, %c0_30] : memref<4x6x32xf32, #tpu.memory_space<vmem>>, vector<1x6x32xf32>
    %57 = vector.shape_cast %56 : vector<1x6x32xf32> to vector<6x32xf32>
    %c3_31 = arith.constant 3 : index
    %c0_32 = arith.constant 0 : index
    %c0_33 = arith.constant 0 : index
    %58 = vector.load %arg3[%c3_31, %c0_32, %c0_33] : memref<4x6x32xf32, #tpu.memory_space<vmem>>, vector<1x6x32xf32>
    %59 = vector.shape_cast %58 : vector<1x6x32xf32> to vector<6x32xf32>
    %60 = arith.subf %45, %53 : vector<6x32xf32>
    %61 = math.absf %60 : vector<6x32xf32>
    %62 = arith.subf %47, %55 : vector<6x32xf32>
    %63 = math.absf %62 : vector<6x32xf32>
    %64 = arith.addf %61, %63 : vector<6x32xf32>
    %65 = arith.subf %49, %57 : vector<6x32xf32>
    %66 = math.absf %65 : vector<6x32xf32>
    %67 = arith.addf %64, %66 : vector<6x32xf32>
    %68 = arith.subf %51, %59 : vector<6x32xf32>
    %69 = math.absf %68 : vector<6x32xf32>
    %70 = arith.addf %67, %69 : vector<6x32xf32>
    %cst_34 = arith.constant 5.000000e-01 : f32
    %71 = vector.broadcast %cst_34 : f32 to vector<6x32xf32>
    %72 = arith.mulf %71, %49 : vector<6x32xf32>
    %73 = arith.subf %45, %72 : vector<6x32xf32>
    %cst_35 = arith.constant 5.000000e-01 : f32
    %74 = vector.broadcast %cst_35 : f32 to vector<6x32xf32>
    %75 = arith.mulf %74, %51 : vector<6x32xf32>
    %76 = arith.subf %47, %75 : vector<6x32xf32>
    %cst_36 = arith.constant 5.000000e-01 : f32
    %77 = vector.broadcast %cst_36 : f32 to vector<6x32xf32>
    %78 = arith.mulf %77, %49 : vector<6x32xf32>
    %79 = arith.addf %45, %78 : vector<6x32xf32>
    %cst_37 = arith.constant 5.000000e-01 : f32
    %80 = vector.broadcast %cst_37 : f32 to vector<6x32xf32>
    %81 = arith.mulf %80, %51 : vector<6x32xf32>
    %82 = arith.addf %47, %81 : vector<6x32xf32>
    %cst_38 = arith.constant 5.000000e-01 : f32
    %83 = vector.broadcast %cst_38 : f32 to vector<6x32xf32>
    %84 = arith.mulf %83, %57 : vector<6x32xf32>
    %85 = arith.subf %53, %84 : vector<6x32xf32>
    %cst_39 = arith.constant 5.000000e-01 : f32
    %86 = vector.broadcast %cst_39 : f32 to vector<6x32xf32>
    %87 = arith.mulf %86, %59 : vector<6x32xf32>
    %88 = arith.subf %55, %87 : vector<6x32xf32>
    %cst_40 = arith.constant 5.000000e-01 : f32
    %89 = vector.broadcast %cst_40 : f32 to vector<6x32xf32>
    %90 = arith.mulf %89, %57 : vector<6x32xf32>
    %91 = arith.addf %53, %90 : vector<6x32xf32>
    %cst_41 = arith.constant 5.000000e-01 : f32
    %92 = vector.broadcast %cst_41 : f32 to vector<6x32xf32>
    %93 = arith.mulf %92, %59 : vector<6x32xf32>
    %94 = arith.addf %55, %93 : vector<6x32xf32>
    %95 = arith.subf %79, %73 : vector<6x32xf32>
    %96 = arith.subf %82, %76 : vector<6x32xf32>
    %97 = arith.mulf %95, %96 : vector<6x32xf32>
    %98 = arith.subf %91, %85 : vector<6x32xf32>
    %99 = arith.subf %94, %88 : vector<6x32xf32>
    %100 = arith.mulf %98, %99 : vector<6x32xf32>
    %101 = arith.minimumf %79, %91 : vector<6x32xf32>
    %102 = arith.maximumf %73, %85 : vector<6x32xf32>
    %103 = arith.subf %101, %102 : vector<6x32xf32>
    %cst_42 = arith.constant 0.000000e+00 : f32
    %104 = vector.broadcast %cst_42 : f32 to vector<6x32xf32>
    %105 = arith.maximumf %103, %104 : vector<6x32xf32>
    %106 = arith.minimumf %82, %94 : vector<6x32xf32>
    %107 = arith.maximumf %76, %88 : vector<6x32xf32>
    %108 = arith.subf %106, %107 : vector<6x32xf32>
    %cst_43 = arith.constant 0.000000e+00 : f32
    %109 = vector.broadcast %cst_43 : f32 to vector<6x32xf32>
    %110 = arith.maximumf %108, %109 : vector<6x32xf32>
    %111 = arith.mulf %105, %110 : vector<6x32xf32>
    %112 = arith.addf %97, %100 : vector<6x32xf32>
    %113 = arith.subf %112, %111 : vector<6x32xf32>
    %cst_44 = arith.constant 9.99999993E-9 : f32
    %114 = vector.broadcast %cst_44 : f32 to vector<6x32xf32>
    %115 = arith.addf %113, %114 : vector<6x32xf32>
    %116 = arith.divf %111, %115 : vector<6x32xf32>
    %117 = arith.maximumf %79, %91 : vector<6x32xf32>
    %118 = arith.minimumf %73, %85 : vector<6x32xf32>
    %119 = arith.subf %117, %118 : vector<6x32xf32>
    %120 = arith.maximumf %82, %94 : vector<6x32xf32>
    %121 = arith.minimumf %76, %88 : vector<6x32xf32>
    %122 = arith.subf %120, %121 : vector<6x32xf32>
    %123 = arith.mulf %119, %122 : vector<6x32xf32>
    %124 = arith.subf %123, %113 : vector<6x32xf32>
    %cst_45 = arith.constant 9.99999993E-9 : f32
    %125 = vector.broadcast %cst_45 : f32 to vector<6x32xf32>
    %126 = arith.addf %123, %125 : vector<6x32xf32>
    %127 = arith.divf %124, %126 : vector<6x32xf32>
    %128 = arith.subf %116, %127 : vector<6x32xf32>
    %cst_46 = arith.constant 5.000000e+00 : f32
    %129 = vector.broadcast %cst_46 : f32 to vector<6x32xf32>
    %130 = arith.mulf %129, %70 : vector<6x32xf32>
    %cst_47 = arith.constant 2.000000e+00 : f32
    %131 = vector.broadcast %cst_47 : f32 to vector<6x32xf32>
    %132 = arith.mulf %131, %38 : vector<6x32xf32>
    %133 = arith.addf %130, %132 : vector<6x32xf32>
    %cst_48 = arith.constant 2.000000e+00 : f32
    %134 = vector.broadcast %cst_48 : f32 to vector<6x32xf32>
    %135 = arith.mulf %134, %128 : vector<6x32xf32>
    %136 = arith.subf %133, %135 : vector<6x32xf32>
    %c0_49 = arith.constant 0 : index
    %c0_50 = arith.constant 0 : index
    %137 = vector.load %arg4[%c0_49, %c0_50] : memref<32x1680xbf16, #tpu.memory_space<vmem>>, vector<32x1680xbf16>
    %138 = arith.extf %137 : vector<32x1680xbf16> to vector<32x1680xf32>
    %cst_51 = arith.constant dense<0.000000e+00> : vector<6x1680xf32>
    %139 = tpu.matmul %136, %138, %cst_51 {dimension_numbers = #tpu.dot_dimension_numbers<[1], [0], [0], [1], [0, 0, 1, 1], [], []>} : vector<6x32xf32>, vector<32x1680xf32>, vector<6x1680xf32> -> vector<6x1680xf32>
    %cst_52 = arith.constant dense<0x7F800000> : vector<6xf32>
    %140 = vector.multi_reduction <minimumf>, %139, %cst_52 [1] : vector<6x1680xf32> to vector<6xf32>
    %141 = vector.shape_cast %140 : vector<6xf32> to vector<6x1xf32>
    %142 = tpu.iota {dimensions = array<i32: 1>} : vector<6x1680xi32>
    %143 = vector.broadcast %141 : vector<6x1xf32> to vector<6x1680xf32>
    %144 = arith.cmpf ole, %139, %143 : vector<6x1680xf32>
    %c1680_i32 = arith.constant 1680 : i32
    %145 = vector.broadcast %c1680_i32 : i32 to vector<6x1680xi32>
    %146 = arith.select %144, %142, %145 : vector<6x1680xi1>, vector<6x1680xi32>
    %cst_53 = arith.constant dense<2147483647> : vector<6xi32>
    %147 = vector.multi_reduction <minsi>, %146, %cst_53 [1] : vector<6x1680xi32> to vector<6xi32>
    %148 = vector.shape_cast %147 : vector<6xi32> to vector<6x1xi32>
    %149 = vector.broadcast %148 : vector<6x1xi32> to vector<6x1680xi32>
    %150 = arith.cmpi eq, %142, %149 : vector<6x1680xi32>
    %151 = arith.extui %150 : vector<6x1680xi1> to vector<6x1680xi32>
    %152 = arith.sitofp %151 : vector<6x1680xi32> to vector<6x1680xf32>
    %153 = arith.truncf %152 : vector<6x1680xf32> to vector<6x1680xbf16>
    %cst_54 = arith.constant dense<0.000000e+00> : vector<6x32xf32>
    %154 = tpu.matmul %153, %137, %cst_54 {dimension_numbers = #tpu.dot_dimension_numbers<[1], [1], [0], [0], [0, 0, 1, 0], [], []>} : vector<6x1680xbf16>, vector<32x1680xbf16>, vector<6x32xf32> -> vector<6x32xf32>
    %155 = arith.mulf %154, %70 : vector<6x32xf32>
    %156 = vector.shape_cast %155 : vector<6x32xf32> to vector<1x6x32xf32>
    %cst_55 = arith.constant dense<0.000000e+00> : vector<1xf32>
    %157 = vector.multi_reduction <add>, %156, %cst_55 [1, 2] : vector<1x6x32xf32> to vector<1xf32>
    %158 = vector.shape_cast %157 : vector<1xf32> to vector<1x1x1xf32>
    %159 = vector.extract %158[0, 0, 0] : f32 from vector<1x1x1xf32>
    %cst_56 = arith.constant 1.000000e+00 : f32
    %160 = vector.broadcast %cst_56 : f32 to vector<6x32xf32>
    %161 = arith.subf %160, %128 : vector<6x32xf32>
    %162 = arith.mulf %154, %161 : vector<6x32xf32>
    %163 = vector.shape_cast %162 : vector<6x32xf32> to vector<1x6x32xf32>
    %cst_57 = arith.constant dense<0.000000e+00> : vector<1xf32>
    %164 = vector.multi_reduction <add>, %163, %cst_57 [1, 2] : vector<1x6x32xf32> to vector<1xf32>
    %165 = vector.shape_cast %164 : vector<1xf32> to vector<1x1x1xf32>
    %166 = vector.extract %165[0, 0, 0] : f32 from vector<1x1x1xf32>
    %167 = arith.mulf %154, %38 : vector<6x32xf32>
    %168 = vector.shape_cast %167 : vector<6x32xf32> to vector<1x6x32xf32>
    %cst_58 = arith.constant dense<0.000000e+00> : vector<1xf32>
    %169 = vector.multi_reduction <add>, %168, %cst_58 [1, 2] : vector<1x6x32xf32> to vector<1xf32>
    %170 = vector.shape_cast %169 : vector<1xf32> to vector<1x1x1xf32>
    %171 = vector.extract %170[0, 0, 0] : f32 from vector<1x1x1xf32>
    %172 = arith.addf %43, %171 : f32
    %c0_59 = arith.constant 0 : index
    %173 = memref.load %arg5[%c0_59] : memref<3xf32, #tpu.memory_space<smem>>
    memref.store %172, %arg5[%c0_59] : memref<3xf32, #tpu.memory_space<smem>>
    %c1_60 = arith.constant 1 : index
    %174 = memref.load %arg5[%c1_60] : memref<3xf32, #tpu.memory_space<smem>>
    memref.store %159, %arg5[%c1_60] : memref<3xf32, #tpu.memory_space<smem>>
    %c2_61 = arith.constant 2 : index
    %175 = memref.load %arg5[%c2_61] : memref<3xf32, #tpu.memory_space<smem>>
    memref.store %166, %arg5[%c2_61] : memref<3xf32, #tpu.memory_space<smem>>
    return
  }
}

</mosaic_0001>

<bundles_post_ra>
// kernel: _set_criterion_forward.1
= control target key start
LH: loop header
LB: loop body
LE: loop exit
PB: predicated region body
PF: predicated region fallthrough
CT: control target
= control target key end

     0   :  { %v814_v0 = vlaneseq  ;;  %v4767_v5 = vmov 0.0   ;;  %s4761_s0 = inlined_call_operand.vmem [shape: f32[6,32,9], index: 0, kind: input, shape index: {}]   ;;  %s4762_s1 = inlined_call_operand.vmem [shape: s32[6,32], index: 1, kind: input, shape index: {}]   ;;  %s4763_s2 = inlined_call_operand.vmem [shape: f32[4,6,32], index: 2, kind: input, shape index: {}]   ;;  %s4764_s3 = inlined_call_operand.vmem [shape: f32[4,6,32], index: 3, kind: input, shape index: {}]   ;;  %s4765_s4 = inlined_call_operand.vmem [shape: bf16[32,1680], index: 4, kind: input, shape index: {}]   ;;  %s4766_s5 = inlined_call_operand.vmem [shape: f32[3], index: 5, kind: output, shape index: {}]  }
   0x1   :  { %v3186_v1 = vld [vmem:[%s4761_s0] sm:$0xff]  ;;  %v3191_v2 = vld [vmem:[%s4761_s0 + $0x8] sm:$0xff]  ;;  %1524 = vmatprep.mubr.f32.mxu0 %v4767_v5  ;;  %1595 = vmatprep.mubr.f32.mxu1 %v4767_v5  ;;  %v3223_v19 = vld [vmem:[%s4761_s0 + $0x10] sm:$0xff] }
   0x2   :  { %v2768_v3 = vmul.f32 -1.442695, %v3186_v1  ;;  %v190_v4 = vand.u32 2147483647, %v3186_v1  ;;  %v3197_v6 = vshrl.u32 %v814_v0, 7  ;;  %v3217_v16 = vld [vmem:[%s4761_s0 + $0x20] sm:$0xff] }
   0x3   :  { %v2769_v7 = vmul.f32 -1.442695, %v3191_v2  ;;  %v3203_v8 = vld [vmem:[%s4762_s1] sm:$0x3f]  ;;  %v191_v10 = vand.u32 2147483647, %v3191_v2 }
   0x4   :  { %4809 = vst [vmem:[#allocation5_spill] sm:$0xff] %v3197_v6  ;;  %2939 = vpow2.f32 %v2768_v3  ;;  %v214_v9 = vsub.f32 0.0, %v190_v4  ;;  %v819_v11 = vsub.s32 0, %v3197_v6  ;;  %v838_v12 = vsub.s32 1, %v3197_v6  ;;  %v3237_v27 = vld [vmem:[%s4761_s0 + $0x28] sm:$0xff]  ;;  %v3245_v31 = vld [vmem:[%s4761_s0 + $0x40] sm:$0xff] }
   0x5   :  { %2941 = vpow2.f32 %v2769_v7  ;;  %v502_v17 = vsub.f32 0.0, %v3186_v1  ;;  %v215_v18 = vsub.f32 0.0, %v191_v10  ;;  %v2772_v20 = vmul.f32 -1.442695, %v3217_v16  ;;  %v3263_v45 = vld [vmem:[%s4761_s0 + $0x30] sm:$0xff] }
   0x6   :  { %v238_v13 = vmul.f32 1.442695, %v214_v9  ;;  %v3209_v14 = vrot.slane %v3203_v8, %v819_v11  ;;  %v3212_v15 = vrot.slane %v3203_v8, %v838_v12  ;;  %v574_v21 = vmax.f32 %v3186_v1, 0.0 }
   0x7   :  { %v240_v22 = vmul.f32 1.442695, %v215_v18  ;;  %v194_v23 = vand.u32 2147483647, %v3217_v16  ;;  %v3230_v24 = vand.u32 127, %v814_v0  ;;  %v857_v28 = vsub.s32 2, %v3197_v6 }
   0x8   :  { %2943 = vpow2.f32 %v238_v13  ;;  %822 = vbcast.lane.b32.xlu0 %v3209_v14, 256  ;;  %841 = vbcast.lane.b32.xlu1 %v3212_v15, 256  ;;  %v2770_v25 = vmul.f32 -1.442695, %v3223_v19  ;;  %v192_v26 = vand.u32 2147483647, %v3223_v19 }
   0x9   :  { %4810 = vst [vmem:[#allocation6_spill] sm:$0xff] %v3230_v24  ;;  %2945 = vpow2.f32 %v2772_v20  ;;  %v3240_v29 = vmax.f32 %v502_v17, 0.0  ;;  %v218_v30 = vsub.f32 0.0, %v194_v23  ;;  %v876_v32 = vsub.s32 3, %v3197_v6 }
   0xa   :  { %2947 = vpow2.f32 %v240_v22  ;;  %v216_v33 = vsub.f32 0.0, %v192_v26  ;;  %v2773_v34 = vmul.f32 -1.442695, %v3237_v27  ;;  %v895_v35 = vsub.s32 4, %v3197_v6 }
   0xb   :  { %2949 = vpow2.f32 %v2770_v25  ;;  %v503_v36 = vsub.f32 0.0, %v3191_v2  ;;  %v246_v37 = vmul.f32 1.442695, %v218_v30  ;;  %v195_v38 = vand.u32 2147483647, %v3237_v27 }
   0xc   :  { %826 = vbcast.lane.b32.xlu0 %v3209_v14, 264  ;;  %845 = vbcast.lane.b32.xlu1 %v3212_v15, 264  ;;  %v242_v39 = vmul.f32 1.442695, %v216_v33  ;;  %2951 = vpow2.f32 %v2773_v34  ;;  %v2776_v40 = vmul.f32 -1.442695, %v3245_v31  ;;  %v3257_v42 = vrot.slane %v3203_v8, %v857_v28 }
   0xd   :  { %v198_v41 = vand.u32 2147483647, %v3245_v31  ;;  %v914_v43 = vsub.s32 5, %v3197_v6  ;;  %2953 = vpow2.f32 %v246_v37  ;;  %v219_v44 = vsub.f32 0.0, %v195_v38 }
   0xe   :  { %10 = vsyncpa [#allocation3], 0  ;;  %v3268_v47 = vrot.slane %v3203_v8, %v876_v32  ;;  %2955 = vpow2.f32 %v242_v39  ;;  %v2774_v49 = vmul.f32 -1.442695, %v3263_v45  ;;  %v3272_v50 = vrot.slane %v3203_v8, %v895_v35  ;;  %v3290_v0 = vld [vmem:[%s4761_s0 + $0x18] sm:$0xff]  ;;  %s2759_s9 = sshll.u32 %s4766_s5, 4  ;;  %s2760_s9 = int_to_ptr.vmem [resolvable:$true] %s2759_s9 }
   0xf   :  { %v222_v48 = vsub.f32 0.0, %v198_v41  ;;  %v248_v52 = vmul.f32 1.442695, %v219_v44  ;;  %2957 = vpow2.f32 %v2776_v40  ;;  %v506_v54 = vsub.f32 0.0, %v3217_v16  ;;  %s3136_s12 = scalar_lea.vmem %s2760_s9, 16  ;;  %p3141_p1 = scmp.lt.s32.totalorder %s2760_s9, %s2760_s9 }
  0x10   :  { %830 = vbcast.lane.b32.xlu0 %v3209_v14, 272  ;;  %849 = vbcast.lane.b32.xlu1 %v3212_v15, 272  ;;  %2959 = vpow2.f32 %v2774_v49  ;;  %v196_v56 = vand.u32 2147483647, %v3263_v45  ;;  %v3277_v57 = vrot.slane %v3203_v8, %v914_v43  ;;  %v504_v59 = vsub.f32 0.0, %v3223_v19  ;;  %v3328_v43 = vld [vmem:[%s4761_s0 + $0x48] sm:$0xff]  ;;  %p3137_p0 = scmp.ne.s32.totalorder %s2760_s9, %s3136_s12  ;;  %p3142_p2 = scmp.lt.s32.totalorder %s3136_s12, %s3136_s12 }
  0x11   :  { %v2940_v46 = vpop.eup %2939  ;;  %v254_v55 = vmul.f32 1.442695, %v222_v48  ;;  %v3284_v61 = vmax.f32 %v503_v36, 0.0  ;;  %v575_v62 = vmax.f32 %v3191_v2, 0.0  ;;  %v578_v4 = vmax.f32 %v3217_v16, 0.0 }
  0x12   :  { %v118_v51 = vadd.f32 1.0, %v2940_v46  ;;  %v2942_v53 = vpop.eup %2941  ;;  %v220_v63 = vsub.f32 0.0, %v196_v56  ;;  %v507_v7 = vsub.f32 0.0, %v3237_v27  ;;  %v3295_v8 = vmax.f32 %v506_v54, 0.0  ;;  %p3143_p3 = por %p3142_p2, %p3141_p1 }
  0x13   :  { %v119_v58 = vadd.f32 1.0, %v2942_v53  ;;  %v510_v9 = vsub.f32 0.0, %v3245_v31  ;;  %v3298_v12 = vmax.f32 %v504_v59, 0.0  ;;  %v576_v13 = vmax.f32 %v3223_v19, 0.0 }
  0x14   :  { %2961 = vrcp.f32 %v118_v51  ;;  %860 = vbcast.lane.b32.xlu0 %v3257_v42, 256  ;;  %864 = vbcast.lane.b32.xlu1 %v3257_v42, 264  ;;  %v250_v10 = vmul.f32 1.442695, %v220_v63  ;;  %v193_v17 = vand.u32 2147483647, %v3290_v0  ;;  %p3144_p4 = pnand %p3143_p3, %p3137_p0 }
  0x15   :  { %v3280_v60 = vpop.eup %2943  ;;  %2963 = vpow2.f32 %v248_v52  ;;  %v579_v23 = vmax.f32 %v3237_v27, 0.0  ;;  %v3309_v28 = vmax.f32 %v507_v7, 0.0  ;;  %v582_v30 = vmax.f32 %v3245_v31, 0.0  ;;  %v3468_v27 = vld [vmem:[%s4761_s0 + $0x50] sm:$0xff] }
  0x16   :  { %v286_v3 = vadd.f32 1.0, %v3280_v60  ;;  %2965 = vrcp.f32 %v119_v58  ;;  %v2946_v11 = vpop.eup %2945  ;;  %v289_v20 = vmul.f32 -0.5, %v3280_v60  ;;  %v508_v32 = vsub.f32 0.0, %v3263_v45 }
  0x17   :  { %2967 = vpow2.f32 %v254_v55  ;;  %v3302_v18 = vpop.eup %2947  ;;  %v122_v22 = vadd.f32 1.0, %v2946_v11  ;;  %v292_v33 = vand.u32 2147483647, %v3280_v60  ;;  %v3318_v36 = vmul.f32 -1.442695, %v3290_v0 }
  0x18   :  { %2969 = vlog2.f32 %v286_v3  ;;  %834 = vbcast.lane.b32.xlu0 %v3209_v14, 280  ;;  %853 = vbcast.lane.b32.xlu1 %v3212_v15, 280  ;;  %v2950_v25 = vpop.eup %2949  ;;  %v295_v26 = vadd.f32 1.0, %v3302_v18  ;;  %v3314_v15 = vmax.f32 %v510_v9, 0.0  ;;  %v217_v37 = vsub.f32 0.0, %v193_v17 }
  0x19   :  { %2971 = vpow2.f32 %v250_v10  ;;  %v120_v14 = vadd.f32 1.0, %v2950_v25  ;;  %v2952_v34 = vpop.eup %2951  ;;  %v290_v39 = vadd.f32 1.0, %v289_v20  ;;  %v505_v41 = vsub.f32 0.0, %v3290_v0 }
  0x1a   :  { %2973 = vrcp.f32 %v122_v22  ;;  %v3320_v38 = vpop.eup %2953  ;;  %v123_v40 = vadd.f32 1.0, %v2952_v34  ;;  %v298_v46 = vmul.f32 -0.5, %v3302_v18  ;;  %v301_v48 = vand.u32 2147483647, %v3302_v18 }
  0x1b   :  { %2975 = vlog2.f32 %v295_v26  ;;  %v3330_v44 = vpop.eup %2955  ;;  %v322_v49 = vadd.f32 1.0, %v3320_v38  ;;  %v3335_v51 = vmax.f32 %v508_v32, 0.0  ;;  %vm3337_vm0 = vcmp.lt.f32.partialorder %v292_v33, 0.0004427343 }
  0x1c   :  { %868 = vbcast.lane.b32.xlu0 %v3257_v42, 272  ;;  %879 = vbcast.lane.b32.xlu1 %v3268_v47, 256  ;;  %2977 = vrcp.f32 %v120_v14  ;;  %v2958_v52 = vpop.eup %2957  ;;  %v304_v54 = vadd.f32 1.0, %v3330_v44  ;;  %v325_v58 = vmul.f32 -0.5, %v3320_v38  ;;  %v199_v63 = vand.u32 2147483647, %v3328_v43 }
  0x1d   :  { %2979 = vrcp.f32 %v123_v40  ;;  %v2960_v56 = vpop.eup %2959  ;;  %v126_v59 = vadd.f32 1.0, %v2958_v52  ;;  %v291_v7 = vmul.f32 %v3280_v60, %v290_v39  ;;  %v3348_v9 = vmul.f32 1.442695, %v217_v37 }
  0x1e   :  { %2981 = vlog2.f32 %v322_v49  ;;  %v3350_v10 = vmax.f32 %v505_v41, 0.0  ;;  %v299_v20 = vadd.f32 1.0, %v298_v46  ;;  %vm3354_vm1 = vcmp.lt.f32.partialorder %v301_v48, 0.0004427343 }
  0x1f   :  { %2983 = vlog2.f32 %v304_v54  ;;  %v3359_v25 = vmul.f32 -1.442695, %v3328_v43  ;;  %v307_v60 = vmul.f32 -0.5, %v3330_v44  ;;  %v326_v34 = vadd.f32 1.0, %v325_v58 }
  0x20   :  { %883 = vbcast.lane.b32.xlu0 %v3268_v47, 264  ;;  %872 = vbcast.lane.b32.xlu1 %v3257_v42, 280  ;;  %v328_v42 = vand.u32 2147483647, %v3320_v38  ;;  %v310_v37 = vand.u32 2147483647, %v3330_v44  ;;  %2985 = vrcp.f32 %v126_v59  ;;  %v300_v59 = vmul.f32 %v3302_v18, %v299_v20 }
  0x21   :  { %v2962_v3 = vpop.eup %2961  ;;  %v3368_v39 = vsub.f32 0.0, %v199_v63  ;;  %v124_v48 = vadd.f32 1.0, %v2960_v56  ;;  %v308_v55 = vadd.f32 1.0, %v307_v60  ;;  %v327_v20 = vmul.f32 %v3320_v38, %v326_v34 }
  0x22   :  { %v3352_v11 = vpop.eup %2963  ;;  %v622_v17 = vsub.f32 1.0, %v2962_v3  ;;  %v646_v54 = vmul.f32 %v2962_v3, %v2962_v3  ;;  %vm3377_vm2 = vcmp.lt.f32.partialorder %v328_v42, 0.0004427343  ;;  %vm3388_vm3 = vcmp.lt.f32.partialorder %v310_v37, 0.0004427343 }
  0x23   :  { %v2966_v26 = vpop.eup %2965  ;;  %v331_v32 = vadd.f32 1.0, %v3352_v11  ;;  %v334_v35 = vmul.f32 -0.5, %v3352_v11  ;;  %v337_v53 = vand.u32 2147483647, %v3352_v11  ;;  %vm4808_vm14 = vcmask 72704  }
  0x24   :  { %v3365_v14 = vpop.eup %2967  ;;  %887 = vbcast.lane.b32.xlu0 %v3268_v47, 272  ;;  %898 = vbcast.lane.b32.xlu1 %v3272_v50, 256  ;;  %v623_v41 = vsub.f32 1.0, %v2966_v26  ;;  %v718_v58 = vmul.f32 %v622_v17, %v622_v17  ;;  %v647_v56 = vmul.f32 %v2966_v26, %v2966_v26  ;;  %v670_v26 = vmul.f32 0.75, %v646_v54 }
  0x25   :  { %v2970_v40 = vpop.eup %2969  ;;  %2987 = vlog2.f32 %v331_v32  ;;  %v358_v46 = vadd.f32 1.0, %v3365_v14  ;;  %v361_v38 = vmul.f32 -0.5, %v3365_v14  ;;  %v335_v5 = vadd.f32 1.0, %v334_v35 }
  0x26   :  { %v3373_v49 = vpop.eup %2971  ;;  %v288_v52 = vmul.f32 0.6931472, %v2970_v40  ;;  %v719_v18 = vmul.f32 %v623_v41, %v623_v41  ;;  %v742_v60 = vmul.f32 0.25, %v718_v58  ;;  %vm3405_vm4 = vcmp.lt.f32.partialorder %v337_v53, 0.0004427343 }
  0x27   :  { %2989 = vlog2.f32 %v358_v46  ;;  %v2974_v33 = vpop.eup %2973  ;;  %v340_v3 = vadd.f32 1.0, %v3373_v49  ;;  %v364_v35 = vand.u32 2147483647, %v3365_v14 }
  0x28   :  { %v294_v32 = vsel %vm3337_vm0, %v291_v7, %v288_v52  ;;  %v2976_v17 = vpop.eup %2975  ;;  %902 = vbcast.lane.b32.xlu0 %v3272_v50, 264  ;;  %891 = vbcast.lane.b32.xlu1 %v3268_v47, 280  ;;  %2991 = vrcp.f32 %v124_v48  ;;  %v626_v41 = vsub.f32 1.0, %v2974_v33  ;;  %v671_v52 = vmul.f32 0.75, %v647_v56 }
  0x29   :  { %v2978_v7 = vpop.eup %2977  ;;  %v297_v40 = vmul.f32 0.6931472, %v2976_v17  ;;  %2993 = vlog2.f32 %v340_v3  ;;  %v550_v46 = vadd.f32 %v3240_v29, %v294_v32  ;;  %v598_v47 = vadd.f32 %v574_v21, %v294_v32 }
  0x2a   :  { %v2980_v34 = vpop.eup %2979  ;;  %v309_v48 = vmul.f32 %v3330_v44, %v308_v55  ;;  %v743_v21 = vmul.f32 0.25, %v719_v18  ;;  %v624_v58 = vsub.f32 1.0, %v2978_v7  ;;  %v650_v22 = vmul.f32 %v2974_v33, %v2974_v33 }
  0x2b   :  { %v303_v37 = vsel %vm3354_vm1, %v300_v59, %v297_v40  ;;  %v2982_v54 = vpop.eup %2981  ;;  %v3410_v44 = vmul.f32 %v670_v26, %v598_v47  ;;  %v3412_v55 = vmul.f32 %v742_v60, %v550_v46  ;;  %v722_v56 = vmul.f32 %v626_v41, %v626_v41 }
  0x2c   :  { %906 = vbcast.lane.b32.xlu0 %v3272_v50, 272  ;;  %917 = vbcast.lane.b32.xlu1 %v3277_v57, 256  ;;  %v551_v29 = vadd.f32 %v3284_v61, %v303_v37  ;;  %v599_v1 = vadd.f32 %v575_v62, %v303_v37  ;;  %v2984_v32 = vpop.eup %2983  ;;  %v324_v3 = vmul.f32 0.6931472, %v2982_v54  ;;  %v362_v61 = vadd.f32 1.0, %v361_v38 }
  0x2d   :  { %4821 = vst [vmem:[#allocation7_spill] sm:$0xff] %v3410_v44  ;;  %v306_v62 = vmul.f32 0.6931472, %v2984_v32  ;;  %v648_v17 = vmul.f32 %v2978_v7, %v2978_v7  ;;  %v336_v18 = vmul.f32 %v3352_v11, %v335_v5  ;;  %v2986_v33 = vpop.eup %2985  ;;  %v720_v60 = vmul.f32 %v624_v58, %v624_v58  ;;  %v3476_v7 = vld [vmem:[%s4761_s0 + $0x38] sm:$0xff] }
  0x2e   :  { %v330_v2 = vsel %vm3377_vm2, %v327_v20, %v324_v3  ;;  %v3419_v53 = vmul.f32 %v671_v52, %v599_v1  ;;  %v3421_v26 = vmul.f32 %v743_v21, %v551_v29  ;;  %v627_v40 = vsub.f32 1.0, %v2980_v34 }
  0x2f   :  { %v602_v63 = vadd.f32 %v578_v4, %v330_v2  ;;  %v674_v20 = vmul.f32 0.75, %v650_v22  ;;  %vm3425_vm5 = vcmp.lt.f32.partialorder %v364_v35, 0.0004427343  ;;  %v343_v5 = vmul.f32 -0.5, %v3373_v49 }
  0x30   :  { %921 = vbcast.lane.b32.xlu0 %v3277_v57, 264  ;;  %910 = vbcast.lane.b32.xlu1 %v3272_v50, 280  ;;  %v554_v11 = vadd.f32 %v3295_v8, %v330_v2  ;;  %v746_v47 = vmul.f32 0.25, %v722_v56  ;;  %v363_v41 = vmul.f32 %v3365_v14, %v362_v61  ;;  %v312_v16 = vsel %vm3388_vm3, %v309_v48, %v306_v62 }
  0x31   :  { %v672_v4 = vmul.f32 0.75, %v648_v17  ;;  %v630_v52 = vsub.f32 1.0, %v2986_v33  ;;  %v744_v29 = vmul.f32 0.25, %v720_v60  ;;  %v651_v1 = vmul.f32 %v2980_v34, %v2980_v34 }
  0x32   :  { %v2988_v46 = vpop.eup %2987  ;;  %v723_v8 = vmul.f32 %v627_v40, %v627_v40  ;;  %v3440_v58 = vmul.f32 %v674_v20, %v602_v63  ;;  %v654_v32 = vmul.f32 %v2986_v33, %v2986_v33  ;;  %v344_v42 = vadd.f32 1.0, %v343_v5 }
  0x33   :  { %v333_v37 = vmul.f32 0.6931472, %v2988_v46  ;;  %v3442_v3 = vmul.f32 %v746_v47, %v554_v11  ;;  %v600_v22 = vadd.f32 %v576_v13, %v312_v16  ;;  %v346_v35 = vand.u32 2147483647, %v3373_v49 }
  0x34   :  { %v2990_v38 = vpop.eup %2989  ;;  %925 = vbcast.lane.b32.xlu0 %v3277_v57, 272  ;;  %929 = vbcast.lane.b32.xlu1 %v3277_v57, 280  ;;  %4824 = vst [vmem:[#allocation8_spill] sm:$0xff] %v3440_v58  ;;  %v552_v34 = vadd.f32 %v3298_v12, %v312_v16  ;;  %v726_v56 = vmul.f32 %v630_v52, %v630_v52  ;;  %v675_v62 = vmul.f32 0.75, %v651_v1  ;;  %v747_v17 = vmul.f32 0.25, %v723_v8  ;;  %v3504_v8 = vld [vmem:[%s4761_s0 + $0x60] sm:$0xff] }
  0x35   :  { %v2992_v21 = vpop.eup %2991  ;;  %v360_v14 = vmul.f32 0.6931472, %v2990_v38  ;;  %v339_v57 = vsel %vm3405_vm4, %v336_v18, %v333_v37  ;;  %v345_v2 = vmul.f32 %v3373_v49, %v344_v42  ;;  %vm347_vm6 = vcmp.lt.f32.partialorder %v346_v35, 0.0004427343 }
  0x36   :  { %v2994_v48 = vpop.eup %2993  ;;  %v628_v60 = vsub.f32 1.0, %v2992_v21  ;;  %v555_v19 = vadd.f32 %v3309_v28, %v339_v57  ;;  %v603_v13 = vadd.f32 %v579_v23, %v339_v57  ;;  %2995 = vpow2.f32 %v3318_v36  ;;  %v3516_v57 = vld [vmem:[%s4761_s0 + $0x70] sm:$0xff] }
  0x37   :  { %v342_v61 = vmul.f32 0.6931472, %v2994_v48  ;;  %v366_v33 = vsel %vm3425_vm5, %v363_v41, %v360_v14  ;;  %v3459_v59 = vmul.f32 %v672_v4, %v600_v22  ;;  %v678_v49 = vmul.f32 0.75, %v654_v32 }
  0x38   :  { %v652_v18 = vmul.f32 %v2992_v21, %v2992_v21  ;;  %v3461_v40 = vmul.f32 %v744_v29, %v552_v34  ;;  %v606_v46 = vadd.f32 %v582_v30, %v366_v33  ;;  %v750_v63 = vmul.f32 0.25, %v726_v56 }
  0x39   :  { %4825 = vst [vmem:[#allocation9_spill] sm:$0xff] %v3459_v59  ;;  %v348_v28 = vsel %vm347_vm6, %v345_v2, %v342_v61  ;;  %v558_v23 = vadd.f32 %v3314_v15, %v366_v33  ;;  %v724_v36 = vmul.f32 %v628_v60, %v628_v60  ;;  %2997 = vpow2.f32 %v3348_v9 }
  0x3a   :  { %v256_v20 = vmul.f32 1.442695, %v3368_v39  ;;  %v3478_v31 = vmul.f32 %v675_v62, %v603_v13  ;;  %v3480_v30 = vmul.f32 %v747_v17, %v555_v19  ;;  %2999 = vpow2.f32 %v3359_v25  ;;  %v3490_v39 = vld [vmem:[%s4761_s0 + $0x68] sm:$0xff] }
  0x3b   :  { %v2778_v5 = vmul.f32 -1.442695, %v3468_v27  ;;  %v4826_v15 = vmax.f32 %v3263_v45, 0.0  ;;  %v676_v47 = vmul.f32 0.75, %v652_v18  ;;  %v200_v9 = vand.u32 2147483647, %v3468_v27 }
  0x3c   :  { %3001 = vpow2.f32 %v256_v20  ;;  %v3492_v41 = vmul.f32 %v678_v49, %v606_v46  ;;  %v2775_v38 = vmul.f32 -1.442695, %v3476_v7  ;;  %v197_v25 = vand.u32 2147483647, %v3476_v7  ;;  %v3540_v20 = vld [vmem:[%s4761_s0 + $0x58] sm:$0xff] }
  0x3d   :  { %v604_v11 = vadd.f32 %v4826_v15, %v348_v28  ;;  %3003 = vpow2.f32 %v2778_v5  ;;  %v3496_v16 = vmul.f32 %v750_v63, %v558_v23  ;;  %v556_v45 = vadd.f32 %v3335_v51, %v348_v28  ;;  %4832 = vst [vmem:[#allocation14_spill] sm:$0xff] %v3540_v20 }
  0x3e   :  { %4827 = vst [vmem:[#allocation10_spill] sm:$0xff] %v3492_v41  ;;  %v748_v4 = vmul.f32 0.25, %v724_v36  ;;  %v224_v37 = vsub.f32 0.0, %v200_v9  ;;  %3005 = vpow2.f32 %v2775_v38  ;;  %v221_v52 = vsub.f32 0.0, %v197_v25 }
  0x3f   :  { %4828 = vst [vmem:[#allocation11_spill] sm:$0xff] %v3496_v16  ;;  %v2781_v29 = vmul.f32 -1.442695, %v3490_v39  ;;  %v203_v1 = vand.u32 2147483647, %v3490_v39  ;;  %v3510_v51 = vmul.f32 %v676_v47, %v604_v11  ;;  %v512_v34 = vsub.f32 0.0, %v3468_v27 }
  0x40   :  { %v258_v32 = vmul.f32 1.442695, %v224_v37  ;;  %v252_v42 = vmul.f32 1.442695, %v221_v52  ;;  %v2780_v22 = vmul.f32 -1.442695, %v3504_v8  ;;  %v3518_v35 = vmul.f32 %v748_v4, %v556_v45 }
  0x41   :  { %4829 = vst [vmem:[#allocation12_spill] sm:$0xff] %v3510_v51  ;;  %3007 = vpow2.f32 %v2781_v29  ;;  %v227_v48 = vsub.f32 0.0, %v203_v1  ;;  %v202_v56 = vand.u32 2147483647, %v3504_v8  ;;  %v509_v2 = vsub.f32 0.0, %v3476_v7 }
  0x42   :  { %4830 = vst [vmem:[#allocation13_spill] sm:$0xff] %v3518_v35  ;;  %3009 = vpow2.f32 %v258_v32  ;;  %v4831_v33 = vsub.f32 0.0, %v3328_v43  ;;  %v204_v13 = vand.u32 2147483647, %v3516_v57  ;;  %v515_v18 = vsub.f32 0.0, %v3490_v39 }
  0x43   :  { %3011 = vpow2.f32 %v252_v42  ;;  %v264_v62 = vmul.f32 1.442695, %v227_v48  ;;  %v2996_v17 = vpop.eup %2995  ;;  %v226_v19 = vsub.f32 0.0, %v202_v56  ;;  %v2782_v46 = vmul.f32 -1.442695, %v3516_v57 }
  0x44   :  { %v3527_v60 = vmax.f32 %v4831_v33, 0.0  ;;  %3013 = vpow2.f32 %v2780_v22  ;;  %v121_v49 = vadd.f32 1.0, %v2996_v17  ;;  %v3534_v28 = vmax.f32 %v512_v34, 0.0 }
  0x45   :  { %3015 = vpow2.f32 %v264_v62  ;;  %v262_v36 = vmul.f32 1.442695, %v226_v19  ;;  %v3542_v15 = vmax.f32 %v509_v2, 0.0  ;;  %v228_v45 = vsub.f32 0.0, %v204_v13 }
  0x46   :  { %v2998_v5 = vpop.eup %2997  ;;  %3017 = vrcp.f32 %v121_v49  ;;  %v3548_v52 = vmax.f32 %v515_v18, 0.0  ;;  %v201_v29 = vand.u32 2147483647, %v3540_v20  ;;  %v514_v42 = vsub.f32 0.0, %v3504_v8 }
  0x47   :  { %v3000_v9 = vpop.eup %2999  ;;  %v313_v38 = vadd.f32 1.0, %v2998_v5  ;;  %v316_v25 = vmul.f32 -0.5, %v2998_v5  ;;  %3019 = vpow2.f32 %v262_v36  ;;  %v2779_v48 = vmul.f32 -1.442695, %v3540_v20 }
  0x48   :  { %v127_v37 = vadd.f32 1.0, %v3000_v9  ;;  %3021 = vpow2.f32 %v2782_v46  ;;  %v319_v22 = vand.u32 2147483647, %v2998_v5  ;;  %v516_v56 = vsub.f32 0.0, %v3516_v57 }
  0x49   :  { %v3546_v4 = vpop.eup %3001  ;;  %3023 = vlog2.f32 %v313_v38  ;;  %v317_v62 = vadd.f32 1.0, %v316_v25  ;;  %v266_v33 = vmul.f32 1.442695, %v228_v45  ;;  %v225_v13 = vsub.f32 0.0, %v201_v29 }
  0x4a   :  { %v3004_v1 = vpop.eup %3003  ;;  %v367_v32 = vadd.f32 1.0, %v3546_v4  ;;  %3025 = vrcp.f32 %v127_v37  ;;  %v513_v49 = vsub.f32 0.0, %v3540_v20  ;;  %v370_v46 = vmul.f32 -0.5, %v3546_v4 }
  0x4b   :  { %v128_v34 = vadd.f32 1.0, %v3004_v1  ;;  %v3006_v2 = vpop.eup %3005  ;;  %v3558_v36 = vmax.f32 %v514_v42, 0.0  ;;  %vm3563_vm7 = vcmp.lt.f32.partialorder %v319_v22, 0.0004427343  ;;  %v3567_v37 = vmax.f32 %v516_v56, 0.0  ;;  %v3576_v22 = vld [vmem:[%s4761_s0 + $0x88] sm:$0xff] }
  0x4c   :  { %3027 = vlog2.f32 %v367_v32  ;;  %v125_v19 = vadd.f32 1.0, %v3006_v2  ;;  %v318_v1 = vmul.f32 %v2998_v5, %v317_v62  ;;  %v373_v32 = vand.u32 2147483647, %v3546_v4 }
  0x4d   :  { %3029 = vrcp.f32 %v128_v34  ;;  %v3571_v61 = vmax.f32 %v513_v49, 0.0  ;;  %v3585_v21 = vmul.f32 -1.442695, %v3576_v22 }
  0x4e   :  { %v3008_v18 = vpop.eup %3007  ;;  %3031 = vpow2.f32 %v2779_v48  ;;  %v260_v48 = vmul.f32 1.442695, %v225_v13  ;;  %vm3580_vm8 = vcmp.lt.f32.partialorder %v373_v32, 0.0004427343 }
  0x4f   :  { %v3561_v38 = vpop.eup %3009  ;;  %3033 = vrcp.f32 %v125_v19  ;;  %v131_v45 = vadd.f32 1.0, %v3008_v18  ;;  %4835 = vst [vmem:[#allocation15_spill] sm:$0xff] %v3571_v61  ;;  %v371_v19 = vadd.f32 1.0, %v370_v46 }
  0x50   :  { %v3012_v29 = vpop.eup %3011  ;;  %v376_v42 = vadd.f32 1.0, %v3561_v38  ;;  %3035 = vpow2.f32 %v266_v33  ;;  %v379_v18 = vmul.f32 -0.5, %v3561_v38  ;;  %v382_v62 = vand.u32 2147483647, %v3561_v38 }
  0x51   :  { %v3014_v34 = vpop.eup %3013  ;;  %v349_v2 = vadd.f32 1.0, %v3012_v29  ;;  %3037 = vrcp.f32 %v131_v45  ;;  %v352_v33 = vmul.f32 -0.5, %v3012_v29  ;;  %v355_v14 = vand.u32 2147483647, %v3012_v29 }
  0x52   :  { %v3016_v56 = vpop.eup %3015  ;;  %3039 = vlog2.f32 %v376_v42  ;;  %v130_v5 = vadd.f32 1.0, %v3014_v34  ;;  %v372_v54 = vmul.f32 %v3546_v4, %v371_v19  ;;  %vm3591_vm9 = vcmp.lt.f32.partialorder %v382_v62, 0.0004427343 }
  0x53   :  { %3041 = vlog2.f32 %v349_v2  ;;  %v403_v63 = vadd.f32 1.0, %v3016_v56  ;;  %v3018_v45 = vpop.eup %3017  ;;  %v406_v49 = vmul.f32 -0.5, %v3016_v56  ;;  %v353_v17 = vadd.f32 1.0, %v352_v33 }
  0x54   :  { %3043 = vrcp.f32 %v130_v5  ;;  %v3020_v42 = vpop.eup %3019  ;;  %v625_v34 = vsub.f32 1.0, %v3018_v45  ;;  %v380_v5 = vadd.f32 1.0, %v379_v18  ;;  %v409_v47 = vand.u32 2147483647, %v3016_v56 }
  0x55   :  { %3045 = vlog2.f32 %v403_v63  ;;  %v3022_v2 = vpop.eup %3021  ;;  %v394_v32 = vadd.f32 1.0, %v3020_v42  ;;  %v397_v12 = vmul.f32 -0.5, %v3020_v42  ;;  %v649_v23 = vmul.f32 %v3018_v45, %v3018_v45 }
  0x56   :  { %v3024_v9 = vpop.eup %3023  ;;  %3047 = vpow2.f32 %v260_v48  ;;  %v407_v6 = vadd.f32 1.0, %v406_v49  ;;  %v721_v16 = vmul.f32 %v625_v34, %v625_v34  ;;  %vm3595_vm10 = vcmp.lt.f32.partialorder %v355_v14, 0.0004427343 }
  0x57   :  { %v3026_v11 = vpop.eup %3025  ;;  %v315_v46 = vmul.f32 0.6931472, %v3024_v9  ;;  %3049 = vlog2.f32 %v394_v32  ;;  %v132_v19 = vadd.f32 1.0, %v3022_v2  ;;  %v398_v9 = vadd.f32 1.0, %v397_v12 }
  0x58   :  { %v655_v33 = vmul.f32 %v3026_v11, %v3026_v11  ;;  %v400_v45 = vand.u32 2147483647, %v3020_v42  ;;  %v631_v34 = vsub.f32 1.0, %v3026_v11  ;;  %v381_v62 = vmul.f32 %v3561_v38, %v380_v5 }
  0x59   :  { %v3028_v41 = vpop.eup %3027  ;;  %v321_v48 = vsel %vm3563_vm7, %v318_v1, %v315_v46  ;;  %v354_v50 = vmul.f32 %v3012_v29, %v353_v17  ;;  %v673_v14 = vmul.f32 0.75, %v649_v23  ;;  %v408_v51 = vmul.f32 %v3016_v56, %v407_v6 }
  0x5a   :  { %v3030_v18 = vpop.eup %3029  ;;  %v369_v32 = vmul.f32 0.6931472, %v3028_v41  ;;  %vm3604_vm11 = vcmp.lt.f32.partialorder %v409_v47, 0.0004427343  ;;  %v553_v12 = vadd.f32 %v3350_v10, %v321_v48  ;;  %v4844_v1 = vmax.f32 %v3290_v0, 0.0 }
  0x5b   :  { %v3601_v49 = vpop.eup %3031  ;;  %v632_v61 = vsub.f32 1.0, %v3030_v18  ;;  %v745_v41 = vmul.f32 0.25, %v721_v16  ;;  %3051 = vrcp.f32 %v132_v19  ;;  %v679_v38 = vmul.f32 0.75, %v655_v33 }
  0x5c   :  { %v3034_v20 = vpop.eup %3033  ;;  %v601_v46 = vadd.f32 %v4844_v1, %v321_v48  ;;  %v399_v29 = vmul.f32 %v3020_v42, %v398_v9  ;;  %vm3613_vm12 = vcmp.lt.f32.partialorder %v400_v45, 0.0004427343  ;;  %v375_v47 = vsel %vm3580_vm8, %v372_v54, %v369_v32 }
  0x5d   :  { %v3608_v25 = vpop.eup %3035  ;;  %v629_v17 = vsub.f32 1.0, %v3034_v20  ;;  %v727_v56 = vmul.f32 %v631_v34, %v631_v34  ;;  %v656_v5 = vmul.f32 %v3030_v18, %v3030_v18  ;;  %v728_v48 = vmul.f32 %v632_v61, %v632_v61 }
  0x5e   :  { %v3038_v11 = vpop.eup %3037  ;;  %v653_v16 = vmul.f32 %v3034_v20, %v3034_v20  ;;  %v412_v19 = vadd.f32 1.0, %v3608_v25  ;;  %v3620_v1 = vmul.f32 %v673_v14, %v601_v46  ;;  %v3622_v42 = vmul.f32 %v745_v41, %v553_v12 }
  0x5f   :  { %v3040_v6 = vpop.eup %3039  ;;  %v635_v10 = vsub.f32 1.0, %v3038_v11  ;;  %v725_v45 = vmul.f32 %v629_v17, %v629_v17  ;;  %v559_v13 = vadd.f32 %v3527_v60, %v375_v47  ;;  %v4847_v54 = vmax.f32 %v3328_v43, 0.0 }
  0x60   :  { %v3042_v35 = vpop.eup %3041  ;;  %v378_v0 = vmul.f32 0.6931472, %v3040_v6  ;;  %v659_v61 = vmul.f32 %v3038_v11, %v3038_v11  ;;  %v751_v20 = vmul.f32 0.25, %v727_v56  ;;  %v752_v41 = vmul.f32 0.25, %v728_v48 }
  0x61   :  { %v3044_v33 = vpop.eup %3043  ;;  %v351_v9 = vmul.f32 0.6931472, %v3042_v35  ;;  %v607_v18 = vadd.f32 %v4847_v54, %v375_v47  ;;  %v731_v46 = vmul.f32 %v635_v10, %v635_v10  ;;  %v680_v35 = vmul.f32 0.75, %v656_v5 }
  0x62   :  { %v3046_v59 = vpop.eup %3045  ;;  %v384_v32 = vsel %vm3591_vm9, %v381_v62, %v378_v0  ;;  %v677_v17 = vmul.f32 0.75, %v653_v16  ;;  %v634_v6 = vsub.f32 1.0, %v3044_v33  ;;  %v4848_v47 = vmax.f32 %v3468_v27, 0.0 }
  0x63   :  { %v357_v34 = vsel %vm3595_vm10, %v354_v50, %v351_v9  ;;  %v405_v14 = vmul.f32 0.6931472, %v3046_v59  ;;  %v3631_v12 = vpop.eup %3047  ;;  %v560_v43 = vadd.f32 %v3534_v28, %v384_v32  ;;  %v749_v62 = vmul.f32 0.25, %v725_v45 }
  0x64   :  { %v3050_v60 = vpop.eup %3049  ;;  %v608_v63 = vadd.f32 %v4848_v47, %v384_v32  ;;  %v557_v50 = vadd.f32 %v3542_v15, %v357_v34  ;;  %v4849_v59 = vmax.f32 %v3476_v7, 0.0  ;;  %v683_v56 = vmul.f32 0.75, %v659_v61 }
  0x65   :  { %v411_v11 = vsel %vm3604_vm11, %v408_v51, %v405_v14  ;;  %v658_v5 = vmul.f32 %v3044_v33, %v3044_v33  ;;  %v4850_v0 = vmax.f32 %v3490_v39, 0.0  ;;  %v755_v28 = vmul.f32 0.25, %v731_v46 }
  0x66   :  { %v605_v4 = vadd.f32 %v4849_v59, %v357_v34  ;;  %v563_v10 = vadd.f32 %v3548_v52, %v411_v11  ;;  %v396_v16 = vmul.f32 0.6931472, %v3050_v60  ;;  %v793_v27 = vsub.f32 %v3622_v42, %v3620_v1 }
  0x67   :  { %v611_v48 = vadd.f32 %v4850_v0, %v411_v11  ;;  %v3646_v9 = vmul.f32 %v679_v38, %v607_v18  ;;  %v730_v51 = vmul.f32 %v634_v6, %v634_v6  ;;  %3053 = vlog2.f32 %v412_v19 }
  0x68   :  { %v3648_v15 = vmul.f32 %v751_v20, %v559_v13  ;;  %v3650_v7 = vmul.f32 %v680_v35, %v608_v63  ;;  %v402_v2 = vsel %vm3613_vm12, %v399_v29, %v396_v16  ;;  %v415_v52 = vmul.f32 -0.5, %v3608_v25  ;;  %v3052_v39 = vpop.eup %3051  ;;  %v3694_v63 = vld [vmem:[%s4761_s0 + $0x90] sm:$0xff] }
  0x69   :  { %v3655_v33 = vmul.f32 %v752_v41, %v560_v43  ;;  %v3657_v45 = vmul.f32 %v677_v17, %v605_v4  ;;  %v3659_v54 = vmul.f32 %v749_v62, %v557_v50  ;;  %v682_v38 = vmul.f32 0.75, %v658_v5 }
  0x6a   :  { %v3661_v18 = vmul.f32 %v683_v56, %v611_v48  ;;  %v3663_v19 = vmul.f32 %v755_v28, %v563_v10  ;;  %v418_v13 = vand.u32 2147483647, %v3608_v25  ;;  %v129_v32 = vadd.f32 1.0, %v3601_v49  ;;  %v3707_v10 = vld [vmem:[%s4761_s0 + $0x78] sm:$0xff] }
  0x6b   :  { %v562_v29 = vadd.f32 %v3558_v36, %v402_v2  ;;  %v4851_v23 = vmax.f32 %v3504_v8, 0.0  ;;  %v754_v20 = vmul.f32 0.25, %v730_v51  ;;  %v385_v34 = vadd.f32 1.0, %v3631_v12  ;;  %v3680_v8 = vld [vmem:[%s4761_s0 + $0x80] sm:$0xff] }
  0x6c   :  { %v799_v14 = vsub.f32 %v3648_v15, %v3646_v9  ;;  %v416_v46 = vadd.f32 1.0, %v415_v52  ;;  %v636_v35 = vsub.f32 1.0, %v3052_v39  ;;  %3055 = vrcp.f32 %v129_v32 }
  0x6d   :  { %v610_v61 = vadd.f32 %v4851_v23, %v402_v2  ;;  %v800_v41 = vsub.f32 %v3655_v33, %v3650_v7  ;;  %v797_v49 = vsub.f32 %v3659_v54, %v3657_v45  ;;  %v660_v17 = vmul.f32 %v3052_v39, %v3052_v39 }
  0x6e   :  { %3057 = vlog2.f32 %v385_v34  ;;  %v803_v36 = vsub.f32 %v3663_v19, %v3661_v18  ;;  %vm3684_vm13 = vcmp.lt.f32.partialorder %v418_v13, 0.0004427343  ;;  %v388_v60 = vmul.f32 -0.5, %v3631_v12  ;;  %v4865_v34 = vld [vmem:[#allocation9_spill] sm:$0xff] }
  0x6f   :  { %v4854_v43 = vand.u32 2147483647, %v3576_v22  ;;  %v3696_v62 = vmul.f32 %v682_v38, %v610_v61  ;;  %v3698_v11 = vmul.f32 %v754_v20, %v562_v29  ;;  %3059 = vpow2.f32 %v3585_v21 }
  0x70   :  { %v2784_v50 = vmul.f32 -1.442695, %v3680_v8  ;;  %v417_v59 = vmul.f32 %v3608_v25, %v416_v46  ;;  %v732_v4 = vmul.f32 %v636_v35, %v636_v35  ;;  %v206_v5 = vand.u32 2147483647, %v3680_v8 }
  0x71   :  { %v231_v47 = vsub.f32 0.0, %v4854_v43  ;;  %4855 = vst [vmem:[#allocation16_spill] sm:$0xff] %v3696_v62  ;;  %v684_v0 = vmul.f32 0.75, %v660_v17  ;;  %v391_v48 = vand.u32 2147483647, %v3631_v12  ;;  %v389_v28 = vadd.f32 1.0, %v388_v60 }
  0x72   :  { %3061 = vpow2.f32 %v2784_v50  ;;  %v208_v21 = vand.u32 2147483647, %v3694_v63  ;;  %v230_v16 = vsub.f32 0.0, %v206_v5  ;;  %v2786_v25 = vmul.f32 -1.442695, %v3694_v63 }
  0x73   :  { %v272_v56 = vmul.f32 1.442695, %v231_v47  ;;  %v802_v51 = vsub.f32 %v3698_v11, %v3696_v62  ;;  %v518_v2 = vsub.f32 0.0, %v3680_v8  ;;  %v205_v39 = vand.u32 2147483647, %v3707_v10 }
  0x74   :  { %v232_v52 = vsub.f32 0.0, %v208_v21  ;;  %v3054_v38 = vpop.eup %3053  ;;  %v756_v13 = vmul.f32 0.25, %v732_v4  ;;  %v4856_v32 = vsub.f32 0.0, %v3576_v22  ;;  %v270_v23 = vmul.f32 1.442695, %v230_v16  ;;  %v3741_v21 = vld [vmem:[%s4761_s0 + $0xa8] sm:$0xff] }
  0x75   :  { %3063 = vpow2.f32 %v272_v56  ;;  %v520_v61 = vsub.f32 0.0, %v3694_v63  ;;  %v414_v20 = vmul.f32 0.6931472, %v3054_v38  ;;  %vm3721_vm15 = vcmp.lt.f32.partialorder %v391_v48, 0.0004427343 }
  0x76   :  { %v3718_v29 = vmax.f32 %v4856_v32, 0.0  ;;  %v591_v46 = vmax.f32 %v3576_v22, 0.0  ;;  %v229_v35 = vsub.f32 0.0, %v205_v39  ;;  %v390_v17 = vmul.f32 %v3631_v12, %v389_v28 }
  0x77   :  { %v590_v60 = vmax.f32 %v3680_v8, 0.0  ;;  %3065 = vpow2.f32 %v2786_v25  ;;  %v2783_v43 = vmul.f32 -1.442695, %v3707_v10  ;;  %v420_v4 = vsel %vm3684_vm13, %v417_v59, %v414_v20 }
  0x78   :  { %3067 = vpow2.f32 %v270_v23  ;;  %v3731_v56 = vmax.f32 %v518_v2, 0.0  ;;  %v274_v5 = vmul.f32 1.442695, %v232_v52  ;;  %v3735_v48 = vmax.f32 %v520_v61, 0.0 }
  0x79   :  { %v3056_v28 = vpop.eup %3055  ;;  %v4859_v6 = vmov 0.0   ;;  %v4860_v25 = vmax.f32 %v3516_v57, 0.0  ;;  %v268_v52 = vmul.f32 1.442695, %v229_v35  ;;  %v4861_v38 = vsub.f32 %v3412_v55, %v3410_v44 }
  0x7a   :  { %v823_v47 = vpop.permute.xlu0 %822  ;;  %v842_v50 = vpop.permute.xlu1 %841  ;;  %v4862_v23 = vsub.f32 %v3442_v3, %v3440_v58  ;;  %v564_v20 = vadd.f32 %v3567_v37, %v420_v4  ;;  %3069 = vpow2.f32 %v2783_v43  ;;  %v2789_v57 = vmul.f32 -1.442695, %v3741_v21 }
  0x7b   :  { %vm931_vm0 = vcmp.eq.s32.totalorder %v3230_v24, %v823_v47  ;;  %vm935_vm1 = vcmp.eq.s32.totalorder %v3230_v24, %v842_v50  ;;  %v612_v2 = vadd.f32 %v4860_v25, %v420_v4  ;;  %v3058_v39 = vpop.eup %3057  ;;  %3071 = vpow2.f32 %v274_v5 }
  0x7c   :  { %v2792_v59 = vsel %vm931_vm0, 1.0, %v4859_v6  ;;  %v2796_v16 = vsel %vm935_vm1, 1.0, %v4859_v6  ;;  %v387_v12 = vmul.f32 0.6931472, %v3058_v39  ;;  %v3060_v25 = vpop.eup %3059  ;;  %v633_v3 = vsub.f32 1.0, %v3056_v28 }
  0x7d   :  { %v1003_v32 = vmul.f32 %v2792_v59, %v4861_v38  ;;  %v1007_v61 = vmul.f32 %v2796_v16, %v4862_v23  ;;  %v3761_v43 = vmul.f32 %v684_v0, %v612_v2  ;;  %3073 = vpow2.f32 %v268_v52 }
  0x7e   :  { %v827_v47 = vpop.permute.xlu0 %826  ;;  %v846_v50 = vpop.permute.xlu1 %845  ;;  %v4863_v5 = vsub.f32 %v3421_v26, %v3419_v53  ;;  %v4864_v38 = vsub.f32 %v3480_v30, %v3478_v31  ;;  %v3770_v23 = vmul.f32 %v756_v13, %v564_v20  ;;  %v393_v0 = vsel %vm3721_vm15, %v390_v17, %v387_v12 }
  0x7f   :  { %vm932_vm2 = vcmp.eq.s32.totalorder %v3230_v24, %v827_v47  ;;  %v1028_v55 = vsel %vm4808_vm14, %v1003_v32, 0.0  ;;  %vm936_vm3 = vcmp.eq.s32.totalorder %v3230_v24, %v846_v50  ;;  %v3062_v4 = vpop.eup %3061  ;;  %v1040_v39 = vsel %vm4808_vm14, %v1007_v61, 0.0  ;;  %v4868_v61 = vld [vmem:[#allocation12_spill] sm:$0xff] }
  0x80   :  { %v2793_v59 = vsel %vm932_vm2, 1.0, %v4859_v6  ;;  %1029 = vadd.xlane.f32.xlu0 %v1028_v55  ;;  %v2797_v37 = vsel %vm936_vm3, 1.0, %v4859_v6  ;;  %v657_v2 = vmul.f32 %v3056_v28, %v3056_v28  ;;  %v135_v52 = vadd.f32 1.0, %v3060_v25  ;;  %v4867_v28 = vld [vmem:[#allocation13_spill] sm:$0xff] }
  0x81   :  { %v1004_v16 = vmul.f32 %v2793_v59, %v4863_v5  ;;  %v1008_v32 = vmul.f32 %v2797_v37, %v4864_v38  ;;  %v134_v35 = vadd.f32 1.0, %v3062_v4  ;;  %v729_v26 = vmul.f32 %v633_v3, %v633_v3  ;;  %v4870_v5 = vld [vmem:[#allocation15_spill] sm:$0xff] }
  0x82   :  { %v3772_v47 = vpop.eup %3063  ;;  %v831_v50 = vpop.permute.xlu0 %830  ;;  %3075 = vpow2.f32 %v2789_v57  ;;  %v4866_v17 = vsub.f32 %v3461_v40, %v4865_v34  ;;  %v4869_v20 = vsub.f32 %v4867_v28, %v4868_v61  ;;  %v681_v57 = vmul.f32 0.75, %v657_v2  ;;  %v4874_v2 = vld [vmem:[#allocation10_spill] sm:$0xff] }
  0x83   :  { %v850_v55 = vpop.permute.xlu1 %849  ;;  %vm933_vm4 = vcmp.eq.s32.totalorder %v3230_v24, %v831_v50  ;;  %v1031_v53 = vsel %vm4808_vm14, %v1004_v16, 0.0  ;;  %v1043_v13 = vsel %vm4808_vm14, %v1008_v32, 0.0  ;;  %3077 = vrcp.f32 %v135_v52 }
  0x84   :  { %vm937_vm5 = vcmp.eq.s32.totalorder %v3230_v24, %v850_v55  ;;  %v2794_v31 = vsel %vm933_vm4, 1.0, %v4859_v6  ;;  %1032 = vadd.xlane.f32.xlu1 %v1031_v53  ;;  %1041 = vadd.xlane.f32.xlu0 %v1040_v39  ;;  %v439_v3 = vadd.f32 1.0, %v3772_v47  ;;  %v3066_v59 = vpop.eup %3065  ;;  %v561_v16 = vadd.f32 %v4870_v5, %v393_v0  ;;  %v4871_v39 = vld [vmem:[#allocation14_spill] sm:$0xff] }
  0x85   :  { %v2798_v30 = vsel %vm937_vm5, 1.0, %v4859_v6  ;;  %v1005_v12 = vmul.f32 %v2794_v31, %v4866_v17  ;;  %v4872_v38 = vmax.f32 %v4871_v39, 0.0  ;;  %3079 = vrcp.f32 %v134_v35  ;;  %v3792_v50 = vpop.eup %3067  ;;  %v4873_v35 = vld [vmem:[#allocation11_spill] sm:$0xff] }
  0x86   :  { %v1009_v25 = vmul.f32 %v2798_v30, %v4869_v20  ;;  %v861_v37 = vpop.permute.xlu0 %860  ;;  %v753_v55 = vmul.f32 0.25, %v729_v26  ;;  %3081 = vlog2.f32 %v439_v3  ;;  %v4875_v31 = vsub.f32 %v4873_v35, %v4874_v2 }
  0x87   :  { %v865_v4 = vpop.permute.xlu1 %864  ;;  %v609_v32 = vadd.f32 %v4872_v38, %v393_v0  ;;  %vm939_vm6 = vcmp.eq.s32.totalorder %v3230_v24, %v861_v37  ;;  %v1034_v40 = vsel %vm4808_vm14, %v1005_v12, 0.0  ;;  %v804_v0 = vsub.f32 %v3770_v23, %v3761_v43  ;;  %v3809_v12 = vpop.eup %3069 }
  0x88   :  { %vm940_vm7 = vcmp.eq.s32.totalorder %v3230_v24, %v865_v4  ;;  %v2800_v52 = vsel %vm939_vm6, 1.0, %v4859_v6  ;;  %1035 = vadd.xlane.f32.xlu1 %v1034_v40  ;;  %1044 = vadd.xlane.f32.xlu0 %v1043_v13  ;;  %v1046_v34 = vsel %vm4808_vm14, %v1009_v25, 0.0  ;;  %v442_v17 = vmul.f32 -0.5, %v3772_v47  ;;  %v3815_v4 = vpop.eup %3071 }
  0x89   :  { %v2801_v53 = vsel %vm940_vm7, 1.0, %v4859_v6  ;;  %v1011_v30 = vmul.f32 %v2800_v52, %v4875_v31  ;;  %v3811_v61 = vmul.f32 %v681_v57, %v609_v32  ;;  %v430_v20 = vadd.f32 1.0, %v3792_v50 }
  0x8a   :  { %v1012_v26 = vmul.f32 %v2801_v53, %v799_v14  ;;  %v835_v13 = vpop.permute.xlu0 %834  ;;  %v433_v3 = vmul.f32 -0.5, %v3792_v50  ;;  %v136_v37 = vadd.f32 1.0, %v3066_v59  ;;  %v777_v15 = vmul.f32 %v753_v55, %v561_v16  ;;  %v3823_v39 = vpop.eup %3073 }
  0x8b   :  { %v854_v28 = vpop.permute.xlu1 %853  ;;  %vm934_vm8 = vcmp.eq.s32.totalorder %v3230_v24, %v835_v13  ;;  %v1052_v9 = vsel %vm4808_vm14, %v1011_v30, 0.0  ;;  %v445_v5 = vand.u32 2147483647, %v3772_v47  ;;  %3083 = vlog2.f32 %v430_v20 }
  0x8c   :  { %vm938_vm9 = vcmp.eq.s32.totalorder %v3230_v24, %v854_v28  ;;  %v2795_v14 = vsel %vm934_vm8, 1.0, %v4859_v6  ;;  %1053 = vadd.xlane.f32.xlu1 %v1052_v9  ;;  %1047 = vadd.xlane.f32.xlu0 %v1046_v34  ;;  %v1055_v38 = vsel %vm4808_vm14, %v1012_v26, 0.0  ;;  %v443_v32 = vadd.f32 1.0, %v442_v17 }
  0x8d   :  { %v2799_v25 = vsel %vm938_vm9, 1.0, %v4859_v6  ;;  %v1006_v59 = vmul.f32 %v2795_v14, %v793_v27  ;;  %v434_v55 = vadd.f32 1.0, %v433_v3  ;;  %v436_v52 = vand.u32 2147483647, %v3792_v50 }
  0x8e   :  { %v1010_v16 = vmul.f32 %v2799_v25, %v797_v49  ;;  %v869_v57 = vpop.permute.xlu0 %868  ;;  %3085 = vrcp.f32 %v136_v37  ;;  %v448_v53 = vadd.f32 1.0, %v3815_v4  ;;  %v451_v42 = vmul.f32 -0.5, %v3815_v4 }
  0x8f   :  { %v880_v40 = vpop.permute.xlu1 %879  ;;  %vm941_vm10 = vcmp.eq.s32.totalorder %v3230_v24, %v869_v57  ;;  %v1037_v1 = vsel %vm4808_vm14, %v1006_v59, 0.0  ;;  %v801_v54 = vsub.f32 %v777_v15, %v3811_v61  ;;  %v3841_v49 = vpop.eup %3075  ;;  %v454_v34 = vand.u32 2147483647, %v3815_v4 }
  0x90   :  { %vm943_vm11 = vcmp.eq.s32.totalorder %v3230_v24, %v880_v40  ;;  %v2802_v27 = vsel %vm941_vm10, 1.0, %v4859_v6  ;;  %1038 = vadd.xlane.f32.xlu1 %v1037_v1  ;;  %1056 = vadd.xlane.f32.xlu0 %v1055_v38  ;;  %3087 = vlog2.f32 %v448_v53  ;;  %v1049_v31 = vsel %vm4808_vm14, %v1010_v16, 0.0  ;;  %v3078_v26 = vpop.eup %3077 }
  0x91   :  { %v2804_v45 = vsel %vm943_vm11, 1.0, %v4859_v6  ;;  %v1013_v35 = vmul.f32 %v2802_v27, %v800_v41  ;;  %v444_v28 = vmul.f32 %v3772_v47, %v443_v32  ;;  %vm3852_vm12 = vcmp.lt.f32.partialorder %v445_v5, 0.0004427343 }
  0x92   :  { %v1015_v30 = vmul.f32 %v2804_v45, %v802_v51  ;;  %v884_v17 = vpop.permute.xlu0 %883  ;;  %v435_v7 = vmul.f32 %v3792_v50, %v434_v55  ;;  %vm3857_vm13 = vcmp.lt.f32.partialorder %v436_v52, 0.0004427343  ;;  %v3080_v41 = vpop.eup %3079  ;;  %v452_v51 = vadd.f32 1.0, %v451_v42 }
  0x93   :  { %v873_v13 = vpop.permute.xlu1 %872  ;;  %vm944_vm15 = vcmp.eq.s32.totalorder %v3230_v24, %v884_v17  ;;  %v1058_v11 = vsel %vm4808_vm14, %v1013_v35, 0.0  ;;  %v639_v3 = vsub.f32 1.0, %v3078_v26  ;;  %v663_v50 = vmul.f32 %v3078_v26, %v3078_v26  ;;  %v3082_v37 = vpop.eup %3081 }
  0x94   :  { %vm942_vm0 = vcmp.eq.s32.totalorder %v3230_v24, %v873_v13  ;;  %v2805_v47 = vsel %vm944_vm15, 1.0, %v4859_v6  ;;  %1059 = vadd.xlane.f32.xlu1 %v1058_v11  ;;  %1050 = vadd.xlane.f32.xlu0 %v1049_v31  ;;  %v1064_v15 = vsel %vm4808_vm14, %v1015_v30, 0.0  ;;  %vm3870_vm1 = vcmp.lt.f32.partialorder %v454_v34, 0.0004427343 }
  0x95   :  { %v2803_v20 = vsel %vm942_vm0, 1.0, %v4859_v6  ;;  %v1016_v9 = vmul.f32 %v2805_v47, %v803_v36  ;;  %v441_v59 = vmul.f32 0.6931472, %v3082_v37  ;;  %v735_v38 = vmul.f32 %v639_v3, %v639_v3 }
  0x96   :  { %v1014_v14 = vmul.f32 %v2803_v20, %v801_v54  ;;  %v888_v5 = vpop.permute.xlu0 %887  ;;  %v638_v16 = vsub.f32 1.0, %v3080_v41  ;;  %v133_v32 = vadd.f32 1.0, %v3809_v12  ;;  %v687_v40 = vmul.f32 0.75, %v663_v50 }
  0x97   :  { %vm945_vm2 = vcmp.eq.s32.totalorder %v3230_v24, %v888_v5  ;;  %v1067_v57 = vsel %vm4808_vm14, %v1016_v9, 0.0  ;;  %v662_v18 = vmul.f32 %v3080_v41, %v3080_v41  ;;  %v447_v36 = vsel %vm3852_vm12, %v444_v28, %v441_v59  ;;  %v899_v1 = vpop.permute.xlu1 %898 }
  0x98   :  { %v2806_v19 = vsel %vm945_vm2, 1.0, %v4859_v6  ;;  %1068 = vadd.xlane.f32.xlu1 %v1067_v57  ;;  %1065 = vadd.xlane.f32.xlu0 %v1064_v15  ;;  %v759_v55 = vmul.f32 0.25, %v735_v38  ;;  %v421_v52 = vadd.f32 1.0, %v3823_v39  ;;  %v3084_v53 = vpop.eup %3083  ;;  %v1061_v42 = vsel %vm4808_vm14, %v1014_v14, 0.0  ;;  %v3916_v38 = vld [vmem:[%s4761_s0 + $0xa0] sm:$0xff] }
  0x99   :  { %v1017_v12 = vmul.f32 %v2806_v19, %v804_v0  ;;  %v567_v27 = vadd.f32 %v3718_v29, %v447_v36  ;;  %v615_v45 = vadd.f32 %v591_v46, %v447_v36  ;;  %v432_v35 = vmul.f32 0.6931472, %v3084_v53 }
  0x9a   :  { %v903_v54 = vpop.permute.xlu0 %902  ;;  %v734_v31 = vmul.f32 %v638_v16, %v638_v16  ;;  %v453_v30 = vmul.f32 %v3815_v4, %v452_v51  ;;  %3089 = vrcp.f32 %v133_v32  ;;  %v686_v23 = vmul.f32 0.75, %v662_v18 }
  0x9b   :  { %v3086_v34 = vpop.eup %3085  ;;  %vm948_vm3 = vcmp.eq.s32.totalorder %v3230_v24, %v903_v54  ;;  %v1070_v26 = vsel %vm4808_vm14, %v1017_v12, 0.0  ;;  %v711_v43 = vmul.f32 %v687_v40, %v615_v45  ;;  %vm947_vm4 = vcmp.eq.s32.totalorder %v3230_v24, %v899_v1  ;;  %v3929_v45 = vld [vmem:[%s4761_s0 + $0xb0] sm:$0xff] }
  0x9c   :  { %v2809_v29 = vsel %vm948_vm3, 1.0, %v4859_v6  ;;  %1071 = vadd.xlane.f32.xlu1 %v1070_v26  ;;  %1062 = vadd.xlane.f32.xlu0 %v1061_v42  ;;  %v783_v22 = vmul.f32 %v759_v55, %v567_v27  ;;  %v438_v46 = vsel %vm3857_vm13, %v435_v7, %v432_v35  ;;  %v758_v13 = vmul.f32 0.25, %v734_v31 }
  0x9d   :  { %v3088_v0 = vpop.eup %3087  ;;  %v566_v4 = vadd.f32 %v3731_v56, %v438_v46  ;;  %v614_v17 = vadd.f32 %v590_v60, %v438_v46  ;;  %v640_v28 = vsub.f32 1.0, %v3086_v34  ;;  %v664_v11 = vmul.f32 %v3086_v34, %v3086_v34 }
  0x9e   :  { %v807_v61 = vsub.f32 %v783_v22, %v711_v43  ;;  %v450_v41 = vmul.f32 0.6931472, %v3088_v0  ;;  %3091 = vlog2.f32 %v421_v52  ;;  %v2808_v33 = vsel %vm947_vm4, 1.0, %v4859_v6  ;;  %v907_v20 = vpop.permute.xlu0 %906 }
  0x9f   :  { %v3898_v51 = vmul.f32 %v686_v23, %v614_v17  ;;  %v782_v47 = vmul.f32 %v758_v13, %v566_v4  ;;  %v4883_v60 = vmax.f32 %v3694_v63, 0.0  ;;  %v688_v50 = vmul.f32 0.75, %v664_v11  ;;  %v3953_v11 = vld [vmem:[%s4761_s0 + $0xb8] sm:$0xff] }
  0xa0   :  { %v1020_v7 = vmul.f32 %v2809_v29, %v807_v61  ;;  %v456_v56 = vsel %vm3870_vm1, %v453_v30, %v450_v41  ;;  %v4884_v37 = vand.u32 2147483647, %v3741_v21  ;;  %v736_v5 = vmul.f32 %v640_v28, %v640_v28  ;;  %v892_v29 = vpop.permute.xlu1 %891 }
  0xa1   :  { %4882 = vst [vmem:[#allocation9_spill] sm:$0xff] %v3898_v51  ;;  %v806_v8 = vsub.f32 %v782_v47, %v3898_v51  ;;  %v616_v3 = vadd.f32 %v4883_v60, %v456_v56  ;;  %v568_v14 = vadd.f32 %v3735_v48, %v456_v56  ;;  %v424_v59 = vmul.f32 -0.5, %v3823_v39 }
  0xa2   :  { %v235_v9 = vsub.f32 0.0, %v4884_v37  ;;  %v1079_v15 = vsel %vm4808_vm14, %v1020_v7, 0.0  ;;  %vm949_vm5 = vcmp.eq.s32.totalorder %v3230_v24, %v907_v20  ;;  %v760_v16 = vmul.f32 0.25, %v736_v5  ;;  %v922_v5 = vpop.permute.xlu0 %921 }
  0xa3   :  { %1080 = vadd.xlane.f32.xlu1 %v1079_v15  ;;  %v1019_v25 = vmul.f32 %v2808_v33, %v806_v8  ;;  %v712_v63 = vmul.f32 %v688_v50, %v616_v3  ;;  %v427_v57 = vand.u32 2147483647, %v3823_v39  ;;  %v517_v48 = vsub.f32 0.0, %v3707_v10 }
  0xa4   :  { %v280_v40 = vmul.f32 1.442695, %v235_v9  ;;  %v784_v18 = vmul.f32 %v760_v16, %v568_v14  ;;  %v425_v19 = vadd.f32 1.0, %v424_v59  ;;  %v2788_v36 = vmul.f32 -1.442695, %v3916_v38  ;;  %v918_v16 = vpop.permute.xlu1 %917 }
  0xa5   :  { %v1076_v32 = vsel %vm4808_vm14, %v1019_v25, 0.0  ;;  %v210_v55 = vand.u32 2147483647, %v3916_v38  ;;  %v2810_v53 = vsel %vm949_vm5, 1.0, %v4859_v6  ;;  %v139_v27 = vadd.f32 1.0, %v3841_v49  ;;  %v3940_v49 = vld [vmem:[%s4761_s0 + $0x98] sm:$0xff] }
  0xa6   :  { %1077 = vadd.xlane.f32.xlu0 %v1076_v32  ;;  %3093 = vpow2.f32 %v280_v40  ;;  %v808_v1 = vsub.f32 %v784_v18, %v712_v63  ;;  %v541_v54 = vmax.f32 %v517_v48, 0.0  ;;  %v589_v35 = vmax.f32 %v3707_v10, 0.0 }
  0xa7   :  { %v3090_v52 = vpop.eup %3089  ;;  %3095 = vpow2.f32 %v2788_v36  ;;  %v234_v31 = vsub.f32 0.0, %v210_v55  ;;  %v426_v34 = vmul.f32 %v3823_v39, %v425_v19  ;;  %vm3933_vm6 = vcmp.lt.f32.partialorder %v427_v57, 0.0004427343  ;;  %v926_v55 = vpop.permute.xlu0 %925 }
  0xa8   :  { %v637_v12 = vsub.f32 1.0, %v3090_v52  ;;  %v661_v42 = vmul.f32 %v3090_v52, %v3090_v52  ;;  %v1021_v30 = vmul.f32 %v2810_v53, %v808_v1  ;;  %v2790_v10 = vmul.f32 -1.442695, %v3929_v45 }
  0xa9   :  { %v278_v22 = vmul.f32 1.442695, %v234_v31  ;;  %v212_v46 = vand.u32 2147483647, %v3929_v45  ;;  %3097 = vrcp.f32 %v139_v27  ;;  %v2787_v28 = vmul.f32 -1.442695, %v3940_v49 }
  0xaa   :  { %v733_v43 = vmul.f32 %v637_v12, %v637_v12  ;;  %v1082_v0 = vsel %vm4808_vm14, %v1021_v30, 0.0  ;;  %v685_v4 = vmul.f32 0.75, %v661_v42  ;;  %vm946_vm7 = vcmp.eq.s32.totalorder %v3230_v24, %v892_v29 }
  0xab   :  { %v3092_v23 = vpop.eup %3091  ;;  %1083 = vadd.xlane.f32.xlu1 %v1082_v0  ;;  %3099 = vpow2.f32 %v278_v22  ;;  %v236_v13 = vsub.f32 0.0, %v212_v46  ;;  %v209_v41 = vand.u32 2147483647, %v3940_v49  ;;  %v2791_v20 = vmul.f32 -1.442695, %v3953_v11 }
  0xac   :  { %v423_v39 = vmul.f32 0.6931472, %v3092_v23  ;;  %v757_v17 = vmul.f32 0.25, %v733_v43  ;;  %3101 = vpow2.f32 %v2790_v10  ;;  %v213_v3 = vand.u32 2147483647, %v3953_v11 }
  0xad   :  { %v282_v7 = vmul.f32 1.442695, %v236_v13  ;;  %3103 = vpow2.f32 %v2787_v28  ;;  %v233_v56 = vsub.f32 0.0, %v209_v41  ;;  %v2807_v50 = vsel %vm946_vm7, 1.0, %v4859_v6 }
  0xae   :  { %v429_v61 = vsel %vm3933_vm6, %v426_v34, %v423_v39  ;;  %v237_v15 = vsub.f32 0.0, %v213_v3  ;;  %vm951_vm8 = vcmp.eq.s32.totalorder %v3230_v24, %v918_v16  ;;  %vm952_vm9 = vcmp.eq.s32.totalorder %v3230_v24, %v922_v5 }
  0xaf   :  { %v565_v47 = vadd.f32 %v541_v54, %v429_v61  ;;  %v613_v33 = vadd.f32 %v589_v35, %v429_v61  ;;  %3105 = vpow2.f32 %v282_v7  ;;  %v276_v37 = vmul.f32 1.442695, %v233_v56 }
  0xb0   :  { %3107 = vpow2.f32 %v2791_v20  ;;  %v284_v32 = vmul.f32 1.442695, %v237_v15  ;;  %v523_v18 = vsub.f32 0.0, %v3741_v21  ;;  %v3966_v12 = vsel %vm951_vm8, 1.0, %v4859_v6 }
  0xb1   :  { %v709_v8 = vmul.f32 %v685_v4, %v613_v33  ;;  %v781_v60 = vmul.f32 %v757_v17, %v565_v47  ;;  %3109 = vpow2.f32 %v276_v37  ;;  %v3969_v42 = vsel %vm952_vm9, 1.0, %v4859_v6 }
  0xb2   :  { %v547_v54 = vmax.f32 %v523_v18, 0.0  ;;  %v522_v35 = vsub.f32 0.0, %v3916_v38  ;;  %vm953_vm10 = vcmp.eq.s32.totalorder %v3230_v24, %v926_v55  ;;  %v595_v34 = vmax.f32 %v3741_v21, 0.0 }
  0xb3   :  { %v805_v9 = vsub.f32 %v781_v60, %v709_v8  ;;  %v3094_v14 = vpop.eup %3093  ;;  %v594_v29 = vmax.f32 %v3916_v38, 0.0  ;;  %v524_v10 = vsub.f32 0.0, %v3929_v45  ;;  %v521_v0 = vsub.f32 0.0, %v3940_v49 }
  0xb4   :  { %v475_v25 = vadd.f32 1.0, %v3094_v14  ;;  %v3096_v63 = vpop.eup %3095  ;;  %v478_v52 = vmul.f32 -0.5, %v3094_v14  ;;  %v481_v46 = vand.u32 2147483647, %v3094_v14  ;;  %v3981_v17 = vsel %vm953_vm10, 1.0, %v4859_v6 }
  0xb5   :  { %v1018_v59 = vmul.f32 %v2807_v50, %v805_v9  ;;  %v138_v48 = vadd.f32 1.0, %v3096_v63  ;;  %v546_v13 = vmax.f32 %v522_v35, 0.0  ;;  %v3985_v7 = vmax.f32 %v524_v10, 0.0  ;;  %v4002_v35 = vpop.permute.xlu1 %910 }
  0xb6   :  { %3111 = vlog2.f32 %v475_v25  ;;  %v3098_v40 = vpop.eup %3097  ;;  %v479_v23 = vadd.f32 1.0, %v478_v52  ;;  %v596_v56 = vmax.f32 %v3929_v45, 0.0  ;;  %vm482_vm11 = vcmp.lt.f32.partialorder %v481_v46, 0.0004427343 }
  0xb7   :  { %v1073_v57 = vsel %vm4808_vm14, %v1018_v59, 0.0  ;;  %3113 = vpow2.f32 %v284_v32  ;;  %v643_v26 = vsub.f32 1.0, %v3098_v40  ;;  %v667_v28 = vmul.f32 %v3098_v40, %v3098_v40 }
  0xb8   :  { %1074 = vadd.xlane.f32.xlu0 %v1073_v57  ;;  %v3962_v19 = vpop.eup %3099  ;;  %3115 = vrcp.f32 %v138_v48  ;;  %v480_v47 = vmul.f32 %v3094_v14, %v479_v23  ;;  %v3988_v8 = vmax.f32 %v521_v0, 0.0  ;;  %v593_v60 = vmax.f32 %v3940_v49, 0.0 }
  0xb9   :  { %v3102_v36 = vpop.eup %3101  ;;  %v466_v53 = vadd.f32 1.0, %v3962_v19  ;;  %v469_v21 = vmul.f32 -0.5, %v3962_v19  ;;  %v739_v61 = vmul.f32 %v643_v26, %v643_v26  ;;  %v472_v9 = vand.u32 2147483647, %v3962_v19  ;;  %v930_v10 = vpop.permute.xlu1 %929 }
  0xba   :  { %v3104_v1 = vpop.eup %3103  ;;  %v140_v27 = vadd.f32 1.0, %v3102_v36  ;;  %v691_v14 = vmul.f32 0.75, %v667_v28  ;;  %v525_v48 = vsub.f32 0.0, %v3953_v11  ;;  %vm950_vm0 = vcmp.eq.s32.totalorder %v3230_v24, %v4002_v35 }
  0xbb   :  { %3117 = vlog2.f32 %v466_v53  ;;  %v137_v31 = vadd.f32 1.0, %v3104_v1  ;;  %v470_v37 = vadd.f32 1.0, %v469_v21  ;;  %v763_v5 = vmul.f32 0.25, %v739_v61 }
  0xbc   :  { %v3972_v30 = vpop.eup %3105  ;;  %3119 = vrcp.f32 %v140_v27  ;;  %vm3998_vm12 = vcmp.lt.f32.partialorder %v472_v9, 0.0004427343  ;;  %v2811_v49 = vsel %vm950_vm0, 1.0, %v4859_v6  ;;  %vm954_vm2 = vcmp.eq.s32.totalorder %v3230_v24, %v930_v10 }
  0xbd   :  { %v3108_v43 = vpop.eup %3107  ;;  %v484_v22 = vadd.f32 1.0, %v3972_v30  ;;  %3121 = vrcp.f32 %v137_v31  ;;  %v487_v33 = vmul.f32 -0.5, %v3972_v30  ;;  %v490_v59 = vand.u32 2147483647, %v3972_v30 }
  0xbe   :  { %v141_v39 = vadd.f32 1.0, %v3108_v43  ;;  %v3110_v4 = vpop.eup %3109  ;;  %v471_v52 = vmul.f32 %v3962_v19, %v470_v37  ;;  %vm1247_vm3 = vcmask 130112   ;;  %vm1254_vm4 = vcmask 195712  }
  0xbf   :  { %3123 = vlog2.f32 %v484_v22  ;;  %v457_v41 = vadd.f32 1.0, %v3110_v4  ;;  %v460_v15 = vmul.f32 -0.5, %v3110_v4  ;;  %v488_v32 = vadd.f32 1.0, %v487_v33 }
  0xc0   :  { %3125 = vrcp.f32 %v141_v39  ;;  %v463_v57 = vand.u32 2147483647, %v3110_v4  ;;  %vm4004_vm13 = vcmp.lt.f32.partialorder %v490_v59, 0.0004427343  ;;  %vm1261_vm5 = vcmask 261312  }
  0xc1   :  { %3127 = vlog2.f32 %v457_v41  ;;  %v461_v1 = vadd.f32 1.0, %v460_v15  ;;  %v489_v19 = vmul.f32 %v3972_v30, %v488_v32  ;;  %vm1358_vm6 = vcmask 1041409  }
  0xc2   :  { %vm4009_vm15 = vcmp.lt.f32.partialorder %v463_v57, 0.0004427343  ;;  %vm1360_vm7 = vcmask 1042434   ;;  %vm1362_vm8 = vcmask 1043459   ;;  %vm1364_vm9 = vcmask 1044484  }
  0xc3   :  { %v3112_v20 = vpop.eup %3111  ;;  %v462_v41 = vmul.f32 %v3110_v4, %v461_v1  ;;  %vm1366_vm10 = vcmask 1045509  }
  0xc4   :  { %v3991_v3 = vpop.eup %3113  ;;  %v477_v50 = vmul.f32 0.6931472, %v3112_v20 }
  0xc5   :  { %v493_v25 = vadd.f32 1.0, %v3991_v3  ;;  %v3116_v63 = vpop.eup %3115  ;;  %v499_v30 = vand.u32 2147483647, %v3991_v3 }
  0xc6   :  { %v483_v16 = vsel %vm482_vm11, %v480_v47, %v477_v50  ;;  %v642_v36 = vsub.f32 1.0, %v3116_v63  ;;  %v666_v55 = vmul.f32 %v3116_v63, %v3116_v63  ;;  %v496_v47 = vmul.f32 -0.5, %v3991_v3 }
  0xc7   :  { %v571_v40 = vadd.f32 %v547_v54, %v483_v16  ;;  %v619_v18 = vadd.f32 %v595_v34, %v483_v16  ;;  %3129 = vlog2.f32 %v493_v25  ;;  %vm500_vm1 = vcmp.lt.f32.partialorder %v499_v30, 0.0004427343 }
  0xc8   :  { %v3118_v27 = vpop.eup %3117  ;;  %v738_v43 = vmul.f32 %v642_v36, %v642_v36  ;;  %v690_v22 = vmul.f32 0.75, %v666_v55  ;;  %vm1456_vm11 = vcmask 261120  }
  0xc9   :  { %v715_v31 = vmul.f32 %v691_v14, %v619_v18  ;;  %v787_v26 = vmul.f32 %v763_v5, %v571_v40  ;;  %v3120_v54 = vpop.eup %3119  ;;  %v468_v34 = vmul.f32 0.6931472, %v3118_v27 }
  0xca   :  { %v762_v0 = vmul.f32 0.25, %v738_v43  ;;  %v644_v39 = vsub.f32 1.0, %v3120_v54  ;;  %v668_v21 = vmul.f32 %v3120_v54, %v3120_v54  ;;  %v3122_v28 = vpop.eup %3121 }
  0xcb   :  { %v811_v46 = vsub.f32 %v787_v26, %v715_v31  ;;  %v474_v61 = vsel %vm3998_vm12, %v471_v52, %v468_v34  ;;  %v641_v59 = vsub.f32 1.0, %v3122_v28  ;;  %v665_v25 = vmul.f32 %v3122_v28, %v3122_v28 }
  0xcc   :  { %v3124_v33 = vpop.eup %3123  ;;  %v570_v50 = vadd.f32 %v546_v13, %v474_v61  ;;  %v618_v37 = vadd.f32 %v594_v29, %v474_v61  ;;  %v692_v9 = vmul.f32 0.75, %v668_v21  ;;  %v740_v5 = vmul.f32 %v644_v39, %v644_v39 }
  0xcd   :  { %v1024_v20 = vmul.f32 %v3969_v42, %v811_v46  ;;  %v3126_v15 = vpop.eup %3125  ;;  %v486_v14 = vmul.f32 0.6931472, %v3124_v33  ;;  %v737_v38 = vmul.f32 %v641_v59, %v641_v59  ;;  %v497_v29 = vadd.f32 1.0, %v496_v47  ;;  %v4072_v59 = vld [vmem:[%s4765_s4 + $0x78] sm:$0xff] }
  0xce   :  { %v4023_v4 = vmul.f32 %v690_v22, %v618_v37  ;;  %v786_v16 = vmul.f32 %v762_v0, %v570_v50  ;;  %v645_v32 = vsub.f32 1.0, %v3126_v15  ;;  %v3128_v57 = vpop.eup %3127  ;;  %v764_v13 = vmul.f32 0.25, %v740_v5  ;;  %v4055_v37 = vld [vmem:[%s4765_s4 + $0xa8] sm:$0xff]  ;;  %v4067_v5 = vld [vmem:[%s4765_s4 + $0x70] sm:$0xff]  ;;  %4897 = vst [vmem:[#allocation11_spill] sm:$0xff] %v4072_v59 }
  0xcf   :  { %v1091_v63 = vsel %vm4808_vm14, %v1024_v20, 0.0  ;;  %v492_v42 = vsel %vm4004_vm13, %v489_v19, %v486_v14  ;;  %v459_v55 = vmul.f32 0.6931472, %v3128_v57  ;;  %v689_v52 = vmul.f32 0.75, %v665_v25  ;;  %4894 = vst [vmem:[#allocation12_spill] sm:$0xff] %v4055_v37  ;;  %4896 = vst [vmem:[#allocation14_spill] sm:$0xff] %v4067_v5 }
  0xd0   :  { %4893 = vst [vmem:[#allocation13_spill] sm:$0xff] %v4023_v4  ;;  %1092 = vadd.xlane.f32.xlu1 %v1091_v63  ;;  %v810_v40 = vsub.f32 %v786_v16, %v4023_v4  ;;  %v572_v18 = vadd.f32 %v3985_v7, %v492_v42  ;;  %v620_v36 = vadd.f32 %v596_v56, %v492_v42  ;;  %v761_v53 = vmul.f32 0.25, %v737_v38  ;;  %v4088_v38 = vld [vmem:[%s4765_s4 + $0x40] sm:$0xff] }
  0xd1   :  { %v669_v1 = vmul.f32 %v3126_v15, %v3126_v15  ;;  %v741_v27 = vmul.f32 %v645_v32, %v645_v32  ;;  %v465_v23 = vsel %vm4009_vm15, %v462_v41, %v459_v55  ;;  %v498_v45 = vmul.f32 %v3991_v3, %v497_v29  ;;  %4899 = vst [vmem:[#allocation18_spill] sm:$0xff] %v4088_v38  ;;  %v4097_v55 = vld [vmem:[%s4765_s4] sm:$0xff] }
  0xd2   :  { %v1023_v31 = vmul.f32 %v3966_v12, %v810_v40  ;;  %v716_v26 = vmul.f32 %v692_v9, %v620_v36  ;;  %v788_v43 = vmul.f32 %v764_v13, %v572_v18  ;;  %v569_v54 = vadd.f32 %v3988_v8, %v465_v23  ;;  %v4060_v9 = vld [vmem:[%s4765_s4 + $0xb0] sm:$0xff]  ;;  %v4083_v13 = vld [vmem:[%s4765_s4 + $0x38] sm:$0xff]  ;;  %4900 = vst [vmem:[#allocation19_spill] sm:$0xff] %v4097_v55 }
  0xd3   :  { %v617_v7 = vadd.f32 %v593_v60, %v465_v23  ;;  %v597_v56 = vmax.f32 %v3953_v11, 0.0  ;;  %v549_v12 = vmax.f32 %v525_v48, 0.0  ;;  %v693_v3 = vmul.f32 0.75, %v669_v1  ;;  %4895 = vst [vmem:[#allocation15_spill] sm:$0xff] %v4060_v9  ;;  %4898 = vst [vmem:[#allocation17_spill] sm:$0xff] %v4083_v13 }
  0xd4   :  { %v3130_v34 = vpop.eup %3129  ;;  %v1088_v22 = vsel %vm4808_vm14, %v1023_v31, 0.0  ;;  %v812_v19 = vsub.f32 %v788_v43, %v716_v26  ;;  %v785_v0 = vmul.f32 %v761_v53, %v569_v54  ;;  %v765_v39 = vmul.f32 0.25, %v741_v27  ;;  %v4111_v26 = vld [vmem:[%s4765_s4 + $0xb8] sm:$0xff]  ;;  %v4116_v43 = vld [vmem:[%s4765_s4 + $0xc0] sm:$0xff] }
  0xd5   :  { %1089 = vadd.xlane.f32.xlu0 %v1088_v22  ;;  %v713_v46 = vmul.f32 %v689_v52, %v617_v7  ;;  %v495_v8 = vmul.f32 0.6931472, %v3130_v34  ;;  %v2815_v33 = vsel %vm954_vm2, 1.0, %v4859_v6  ;;  %v1443_v15 = vunpack.c.h.bf16 %v4055_v37  ;;  %v4102_v52 = vld [vmem:[%s4765_s4 + $0x8] sm:$0xff]  ;;  %4902 = vst [vmem:[#allocation21_spill] sm:$0xff] %v4111_v26  ;;  %4903 = vst [vmem:[#allocation22_spill] sm:$0xff] %v4116_v43 }
  0xd6   :  { %v1025_v60 = vmul.f32 %v3981_v17, %v812_v19  ;;  %v1445_v14 = vunpack.c.h.bf16 %v4060_v9  ;;  %v1442_v25 = vunpack.c.l.bf16 %v4055_v37  ;;  %v1444_v63 = vunpack.c.l.bf16 %v4060_v9  ;;  %4901 = vst [vmem:[#allocation20_spill] sm:$0xff] %v4102_v52 }
  0xd7   :  { %v809_v21 = vsub.f32 %v785_v0, %v713_v46  ;;  %v501_v28 = vsel %vm500_vm1, %v498_v45, %v495_v8  ;;  %1484 = vmatprep.subr.mxu0 %v1443_v15  ;;  %v1429_v16 = vunpack.c.h.bf16 %v4067_v5  ;;  %v1431_v32 = vunpack.c.h.bf16 %v4072_v59 }
  0xd8   :  { %v1094_v11 = vsel %vm4808_vm14, %v1025_v60, 0.0  ;;  %v573_v48 = vadd.f32 %v549_v12, %v501_v28  ;;  %v621_v61 = vadd.f32 %v597_v56, %v501_v28  ;;  %1555 = vmatprep.subr.mxu1 %v1445_v14  ;;  %v1428_v57 = vunpack.c.l.bf16 %v4067_v5  ;;  %1485 = vmatpush1.msra.mxu0 %v1442_v25  ;;  %v4904_v56 = vld [vmem:[#allocation5_spill] sm:$0xff] }
  0xd9   :  { %1095 = vadd.xlane.f32.xlu1 %v1094_v11  ;;  %v1022_v41 = vmul.f32 %v2811_v49, %v809_v21  ;;  %v1430_v42 = vunpack.c.l.bf16 %v4072_v59  ;;  %1556 = vmatpush1.msra.mxu1 %v1444_v63  ;;  %v1415_v29 = vunpack.c.h.bf16 %v4083_v13  ;;  %v1417_v40 = vunpack.c.h.bf16 %v4088_v38 }
  0xda   :  { %v717_v47 = vmul.f32 %v693_v3, %v621_v61  ;;  %v789_v30 = vmul.f32 %v765_v39, %v573_v48  ;;  %1486 = vmatprep.subr.mxu0 %v1429_v16  ;;  %1557 = vmatprep.subr.mxu1 %v1431_v32  ;;  %v1414_v18 = vunpack.c.l.bf16 %v4083_v13  ;;  %v1416_v36 = vunpack.c.l.bf16 %v4088_v38 }
  0xdb   :  { %v1085_v35 = vsel %vm4808_vm14, %v1022_v41, 0.0  ;;  %1487 = vmatpush1.msra.mxu0 %v1428_v57  ;;  %1558 = vmatpush1.msra.mxu1 %v1430_v42  ;;  %v1401_v53 = vunpack.c.h.bf16 %v4097_v55  ;;  %v1403_v1 = vunpack.c.h.bf16 %v4102_v52  ;;  %v1400_v27 = vunpack.c.l.bf16 %v4097_v55 }
  0xdc   :  { %1086 = vadd.xlane.f32.xlu0 %v1085_v35  ;;  %v813_v17 = vsub.f32 %v789_v30, %v717_v47  ;;  %1488 = vmatprep.subr.mxu0 %v1415_v29  ;;  %v1402_v31 = vunpack.c.l.bf16 %v4102_v52  ;;  %v1447_v23 = vunpack.c.h.bf16 %v4111_v26  ;;  %v1449_v54 = vunpack.c.h.bf16 %v4116_v43 }
  0xdd   :  { %1559 = vmatprep.subr.mxu1 %v1417_v40  ;;  %1489 = vmatpush1.msra.mxu0 %v1414_v18  ;;  %v1242_v7 = vadd.s32 4294967288, %v3230_v24  ;;  %v4125_v34 = vsub.s32 %v3230_v24, %v4904_v56  ;;  %v1249_v19 = vadd.s32 4294967280, %v3230_v24  ;;  %v1256_v21 = vadd.s32 4294967272, %v3230_v24 }
  0xde   :  { %v1026_v20 = vmul.f32 %v2815_v33, %v813_v17  ;;  %1560 = vmatpush1.msra.mxu1 %v1416_v36  ;;  %1490 = vmatprep.subr.mxu0 %v1401_v53  ;;  %vm1957_vm12 = vcmask 1045504   ;;  %vm1980_vm13 = vcmask 128000  }
  0xdf   :  { %1561 = vmatprep.subr.mxu1 %v1403_v1  ;;  %1491 = vmatpush1.msra.mxu0 %v1400_v27  ;;  %v4128_v22 = vsub.s32 %v1242_v7, %v4904_v56  ;;  %v4140_v8 = vsub.s32 %v1249_v19, %v4904_v56  ;;  %v4161_v30 = vsub.s32 %v1256_v21, %v4904_v56  ;;  %v4209_v19 = vld [vmem:[%s4763_s2 + $0x10] sm:$0x3f]  ;;  %v4226_v21 = vld [vmem:[%s4764_s3 + $0x18] sm:$0x3f] }
  0xe0   :  { %v1097_v50 = vsel %vm4808_vm14, %v1026_v20, 0.0  ;;  %1562 = vmatpush1.msra.mxu1 %v1402_v31  ;;  %1626 = vmatprep.subr.mxu0 %v1447_v23 }
  0xe1   :  { %1098 = vadd.xlane.f32.xlu0 %v1097_v50  ;;  %1697 = vmatprep.subr.mxu1 %v1449_v54 }
 0x109   :  { %v4121_v45 = vpop.xlane.xlu0 %1029 }
 0x10a   :  { %v2618_v46 = vrot.slane %v4121_v45, %v4125_v34 }
 0x10d   :  { %v4131_v12 = vpop.xlane.xlu1 %1032  ;;  %v4133_v10 = vpop.xlane.xlu0 %1041 }
 0x10e   :  { %v2622_v0 = vrot.slane %v4131_v12, %v4128_v22  ;;  %v2637_v28 = vrot.slane %v4133_v10, %v4125_v34 }
 0x110   :  { %v2623_v49 = vsel %vm1247_vm3, %v2622_v0, %v2618_v46  ;;  %v4214_v46 = vld [vmem:[%s4763_s2 + $0x18] sm:$0x3f] }
 0x111   :  { %v4143_v60 = vpop.xlane.xlu1 %1035  ;;  %v4145_v3 = vpop.xlane.xlu0 %1044 }
 0x112   :  { %v2627_v39 = vrot.slane %v4143_v60, %v4140_v8  ;;  %v2641_v11 = vrot.slane %v4145_v3, %v4128_v22 }
 0x114   :  { %v2628_v48 = vsel %vm1254_vm4, %v2627_v39, %v2623_v49  ;;  %v2642_v61 = vsel %vm1247_vm3, %v2641_v11, %v2637_v28  ;;  %v4221_v39 = vld [vmem:[%s4764_s3 + $0x10] sm:$0x3f]  ;;  %v1145_v11 = vmul.f32 0.5, %v4209_v19 }
 0x115   :  { %v4156_v41 = vpop.xlane.xlu1 %1053  ;;  %v4158_v47 = vpop.xlane.xlu0 %1047 }
 0x116   :  { %v2646_v33 = vrot.slane %v4158_v47, %v4140_v8  ;;  %v2656_v35 = vrot.slane %v4156_v41, %v4125_v34 }
 0x118   :  { %v2647_v17 = vsel %vm1254_vm4, %v2646_v33, %v2642_v61  ;;  %v1147_v61 = vmul.f32 0.5, %v4214_v46  ;;  %v2816_v33 = vld [vmem:[%s4763_s2 + $0x8] sm:$0x3f] }
 0x119   :  { %v4168_v20 = vpop.xlane.xlu1 %1038  ;;  %v4170_v50 = vpop.xlane.xlu0 %1056 }
 0x11a   :  { %v2632_v15 = vrot.slane %v4168_v20, %v4161_v30  ;;  %v2660_v14 = vrot.slane %v4170_v50, %v4128_v22 }
 0x11c   :  { %v2633_v25 = vsel %vm1261_vm5, %v2632_v15, %v2628_v48  ;;  %v2661_v63 = vsel %vm1247_vm3, %v2660_v14, %v2656_v35  ;;  %v1120_v48 = vld [vmem:[%s4763_s2] sm:$0x3f]  ;;  %v1151_v35 = vmul.f32 0.5, %v4221_v39 }
 0x11d   :  { %v4178_v16 = vpop.xlane.xlu1 %1059  ;;  %v4180_v32 = vpop.xlane.xlu0 %1050  ;;  %v1127_v14 = vld [vmem:[%s4764_s3] sm:$0x3f] }
 0x11e   :  { %v2665_v57 = vrot.slane %v4178_v16, %v4140_v8  ;;  %v2651_v42 = vrot.slane %v4180_v32, %v4161_v30 }
 0x120   :  { %v2666_v29 = vsel %vm1254_vm4, %v2665_v57, %v2661_v63  ;;  %v2652_v40 = vsel %vm1261_vm5, %v2651_v42, %v2647_v17  ;;  %v1153_v17 = vmul.f32 0.5, %v4226_v21  ;;  %v1146_v63 = vsub.f32 %v1120_v48, %v1145_v11 }
 0x121   :  { %v4188_v18 = vpop.xlane.xlu1 %1068  ;;  %v4190_v36 = vpop.xlane.xlu0 %1065  ;;  %v2729_v53 = vsel %vm1358_vm6, %v2652_v40, %v2633_v25  ;;  %v2819_v25 = vld [vmem:[%s4764_s3 + $0x8] sm:$0x3f]  ;;  %v1148_v42 = vsub.f32 %v2816_v33, %v1147_v61  ;;  %v1150_v40 = vadd.f32 %v2816_v33, %v1147_v61 }
 0x122   :  { %v2679_v1 = vrot.slane %v4188_v18, %v4128_v22  ;;  %v2675_v27 = vrot.slane %v4190_v36, %v4125_v34 }
 0x124   :  { %v2680_v31 = vsel %vm1247_vm3, %v2679_v1, %v2675_v27  ;;  %v1152_v1 = vsub.f32 %v1127_v14, %v1151_v35  ;;  %v1154_v27 = vsub.f32 %v2819_v25, %v1153_v17 }
 0x125   :  { %v4198_v23 = vpop.xlane.xlu1 %1071  ;;  %v4200_v54 = vpop.xlane.xlu0 %1062 }
 0x126   :  { %v2684_v7 = vrot.slane %v4198_v23, %v4140_v8  ;;  %v2670_v56 = vrot.slane %v4200_v54, %v4161_v30  ;;  %v1164_v51 = vmax.f32 %v1146_v63, %v1152_v1  ;;  %v1168_v2 = vmax.f32 %v1148_v42, %v1154_v27 }
 0x127   :  { %v1181_v59 = vmin.f32 %v1148_v42, %v1154_v27 }
 0x128   :  { %v2685_v0 = vsel %vm1254_vm4, %v2684_v7, %v2680_v31  ;;  %v2671_v49 = vsel %vm1261_vm5, %v2670_v56, %v2666_v29  ;;  %v1149_v29 = vadd.f32 %v1145_v11, %v1120_v48  ;;  %v1155_v31 = vadd.f32 %v1151_v35, %v1127_v14 }
 0x129   :  { %v2730_v28 = vsel %vm1360_vm7, %v2671_v49, %v2729_v53  ;;  %v1156_v7 = vadd.f32 %v2819_v25, %v1153_v17  ;;  %v1158_v11 = vsub.f32 %v1150_v40, %v1148_v42  ;;  %v1191_v42 = vmul.f32 2.0, %v4131_v12 }
 0x12a   :  { %v1163_v4 = vmin.f32 %v1149_v29, %v1155_v31  ;;  %v1157_v44 = vsub.f32 %v1149_v29, %v1146_v63  ;;  %v1160_v61 = vsub.f32 %v1155_v31, %v1152_v1  ;;  %v1177_v13 = vmax.f32 %v1149_v29, %v1155_v31 }
 0x12b   :  { %v1167_v62 = vmin.f32 %v1150_v40, %v1156_v7  ;;  %v1161_v38 = vsub.f32 %v1156_v7, %v1154_v27  ;;  %v1190_v29 = vmul.f32 2.0, %v4121_v45  ;;  %v1199_v12 = vmul.f32 2.0, %v4170_v50 }
 0x12c   :  { %v4239_v15 = vpop.xlane.xlu1 %1080  ;;  %v1165_v35 = vsub.f32 %v1163_v4, %v1164_v51  ;;  %v1159_v9 = vmul.f32 %v1158_v11, %v1157_v44  ;;  %v1193_v50 = vmul.f32 2.0, %v4168_v20 }
 0x12d   :  { %4905 = vst [vmem:[#allocation5_spill] sm:$0xff] %v4239_v15  ;;  %v2698_v57 = vrot.slane %v4239_v15, %v4128_v22  ;;  %v1169_v17 = vsub.f32 %v1167_v62, %v1168_v2  ;;  %v1162_v5 = vmul.f32 %v1161_v38, %v1160_v61  ;;  %v1241_v45 = vrot.slane %v1190_v29, %v4125_v34 }
 0x12e   :  { %v1166_v37 = vmax.f32 %v1165_v35, 0.0  ;;  %v1289_v11 = vrot.slane %v1199_v12, %v4128_v22  ;;  %v1200_v61 = vmul.f32 2.0, %v4178_v16 }
 0x12f   :  { %v4249_v53 = vpop.xlane.xlu0 %1077  ;;  %v1170_v24 = vmax.f32 %v1169_v17, 0.0  ;;  %v1197_v17 = vmul.f32 2.0, %v4180_v32  ;;  %v1260_v32 = vrot.slane %v1193_v50, %v4161_v30 }
 0x130   :  { %4906 = vst [vmem:[#allocation23_spill] sm:$0xff] %v4249_v53  ;;  %v2694_v56 = vrot.slane %v4249_v53, %v4125_v34  ;;  %v1172_v53 = vadd.f32 %v1162_v5, %v1159_v9  ;;  %v1139_v5 = vsub.f32 %v4209_v19, %v4221_v39  ;;  %v1246_v39 = vrot.slane %v1191_v42, %v4128_v22 }
 0x131   :  { %v1171_v26 = vmul.f32 %v1170_v24, %v1166_v37  ;;  %v1136_v24 = vsub.f32 %v2816_v33, %v2819_v25  ;;  %v1194_v33 = vmul.f32 2.0, %v4133_v10 }
 0x132   :  { %v2699_v49 = vsel %vm1247_vm3, %v2698_v57, %v2694_v56  ;;  %v1178_v57 = vmin.f32 %v1146_v63, %v1152_v1  ;;  %v1180_v56 = vmax.f32 %v1150_v40, %v1156_v7  ;;  %v1140_v63 = vand.u32 2147483647, %v1139_v5 }
 0x133   :  { %v1173_v51 = vsub.f32 %v1172_v53, %v1171_v26  ;;  %v1137_v9 = vand.u32 2147483647, %v1136_v24  ;;  %v1192_v53 = vmul.f32 2.0, %v4143_v60  ;;  %v1198_v1 = vmul.f32 2.0, %v4156_v41 }
 0x134   :  { %v4254_v58 = vpop.xlane.xlu1 %1083  ;;  %v1179_v6 = vsub.f32 %v1177_v13, %v1178_v57  ;;  %v1182_v43 = vsub.f32 %v1180_v56, %v1181_v59  ;;  %v1134_v59 = vsub.f32 %v1120_v48, %v1127_v14  ;;  %v1195_v14 = vmul.f32 2.0, %v4145_v3 }
 0x135   :  { %v2703_v52 = vrot.slane %v4254_v58, %v4140_v8  ;;  %v1174_v38 = vadd.f32 1e-08, %v1173_v51  ;;  %v1266_v10 = vrot.slane %v1194_v33, %v4125_v34  ;;  %v1248_v60 = vsel %vm1247_vm3, %v1246_v39, %v1241_v45 }
 0x136   :  { %v1183_v2 = vmul.f32 %v1182_v43, %v1179_v6  ;;  %v1135_v37 = vand.u32 2147483647, %v1134_v59  ;;  %v1142_v6 = vsub.f32 %v4214_v46, %v4226_v21  ;;  %v1196_v46 = vmul.f32 2.0, %v4158_v47 }
 0x137   :  { %v4259_v55 = vsel %vm1254_vm4, %v2703_v52, %v2699_v49  ;;  %v1253_v47 = vrot.slane %v1192_v53, %v4140_v8  ;;  %v1285_v49 = vrot.slane %v1198_v1, %v4125_v34  ;;  %v1203_v57 = vmul.f32 2.0, %v4188_v18  ;;  %v4908_v59 = vld [vmem:[#allocation23_spill] sm:$0xff] }
 0x138   :  { %v1185_v44 = vadd.f32 1e-08, %v1183_v2  ;;  %v1138_v13 = vadd.f32 %v1137_v9, %v1135_v37  ;;  %v1143_v48 = vand.u32 2147483647, %v1142_v6  ;;  %v1275_v41 = vrot.slane %v1196_v46, %v4140_v8 }
 0x139   :  { %v1202_v56 = vmul.f32 2.0, %v4190_v36  ;;  %v1255_v16 = vsel %vm1254_vm4, %v1253_v47, %v1248_v60  ;;  %v1206_v18 = vmul.f32 2.0, %v4908_v59  ;;  %v1290_v36 = vsel %vm1247_vm3, %v1289_v11, %v1285_v49 }
 0x13a   :  { %3131 = vrcp.f32 %v1185_v44  ;;  %v1141_v40 = vadd.f32 %v1140_v63, %v1138_v13  ;;  %v1208_v24 = vmul.f32 2.0, %v4254_v58  ;;  %v1280_v9 = vrot.slane %v1197_v17, %v4161_v30 }
 0x13b   :  { %3133 = vrcp.f32 %v1174_v38  ;;  %v1308_v5 = vrot.slane %v1203_v57, %v4128_v22  ;;  %v1304_v13 = vrot.slane %v1202_v56, %v4125_v34  ;;  %v1323_v58 = vrot.slane %v1206_v18, %v4125_v34  ;;  %v4375_v18 = vld [vmem:[%s4765_s4 + $0x48] sm:$0xff] }
 0x13c   :  { %v4283_v27 = vadd.f32 %v1143_v48, %v1141_v40  ;;  %v1262_v48 = vsel %vm1261_vm5, %v1260_v32, %v1255_v16  ;;  %v4909_v16 = vld [vmem:[#allocation21_spill] sm:$0xff]  ;;  %v4910_v32 = vld [vmem:[#allocation22_spill] sm:$0xff] }
 0x13d   :  { %v1448_v59 = vunpack.c.l.bf16 %v4910_v32 }
 0x13e   :  { %v1189_v49 = vmul.f32 5.0, %v4283_v27 }
 0x141   :  { %v4261_v15 = vpop.xlane.xlu0 %1074 }
 0x142   :  { %v2689_v62 = vrot.slane %v4261_v15, %v4161_v30 }
 0x144   :  { %v2690_v4 = vsel %vm1261_vm5, %v2689_v62, %v2685_v0  ;;  %v1184_v0 = vsub.f32 %v1183_v2, %v1173_v51  ;;  %v1204_v62 = vmul.f32 2.0, %v4198_v23  ;;  %v1201_v2 = vmul.f32 2.0, %v4200_v54  ;;  %v4907_v51 = vld [vmem:[#allocation5_spill] sm:$0xff] }
 0x145   :  { %v4267_v52 = vsel %vm1362_vm8, %v2690_v4, %v2730_v28  ;;  %v1207_v4 = vmul.f32 2.0, %v4907_v51  ;;  %v1294_v23 = vrot.slane %v1200_v61, %v4140_v8  ;;  %v1205_v54 = vmul.f32 2.0, %v4261_v15 }
 0x146   :  { %v1313_v63 = vrot.slane %v1204_v62, %v4140_v8  ;;  %v1299_v6 = vrot.slane %v1201_v2, %v4161_v30 }
 0x147   :  { %v3132_v43 = vpop.eup %3131  ;;  %v1295_v33 = vsel %vm1254_vm4, %v1294_v23, %v1290_v36  ;;  %v4380_v36 = vld [vmem:[%s4765_s4 + $0x50] sm:$0xff] }
 0x148   :  { %v3134_v28 = vpop.eup %3133  ;;  %v1187_v19 = vmul.f32 %v3132_v43, %v1184_v0  ;;  %v1327_v43 = vrot.slane %v1207_v4, %v4128_v22  ;;  %v4368_v4 = vld [vmem:[%s4765_s4 + $0x88] sm:$0xff] }
 0x149   :  { %v1176_v25 = vmul.f32 %v3134_v28, %v1171_v26  ;;  %v1270_v26 = vrot.slane %v1195_v14, %v4128_v22  ;;  %v1332_v14 = vrot.slane %v1208_v24, %v4140_v8 }
 0x14b   :  { %v4288_v31 = vsub.f32 %v1176_v25, %v1187_v19  ;;  %v1271_v20 = vsel %vm1247_vm3, %v1270_v26, %v1266_v10  ;;  %v1318_v25 = vrot.slane %v1205_v54, %v4161_v30  ;;  %v1300_v26 = vsel %vm1261_vm5, %v1299_v6, %v1295_v33  ;;  %v4428_v33 = vld [vmem:[%s4765_s4 + $0x98] sm:$0xff] }
 0x14c   :  { %v1276_v38 = vsel %vm1254_vm4, %v1275_v41, %v1271_v20  ;;  %v1435_v54 = vunpack.c.h.bf16 %v4368_v4  ;;  %v1421_v6 = vunpack.c.h.bf16 %v4380_v36 }
 0x14d   :  { %v1281_v19 = vsel %vm1261_vm5, %v1280_v9, %v1276_v38  ;;  %v1370_v20 = vmul.f32 2.0, %v4288_v31  ;;  %v1446_v38 = vunpack.c.l.bf16 %v4909_v16  ;;  %v1434_v9 = vunpack.c.l.bf16 %v4368_v4 }
 0x159   :  { %v1093_v21 = vpop.xlane.xlu1 %1092 }
 0x15a   :  { %v2717_v3 = vrot.slane %v1093_v21, %v4128_v22  ;;  %v1211_v0 = vmul.f32 2.0, %v1093_v21  ;;  %v1309_v21 = vsel %vm1247_vm3, %v1308_v5, %v1304_v13  ;;  %v4391_v5 = vld [vmem:[%s4765_s4 + $0x10] sm:$0xff]  ;;  %v4396_v13 = vld [vmem:[%s4765_s4 + $0x18] sm:$0xff] }
 0x15b   :  { %v1314_v10 = vsel %vm1254_vm4, %v1313_v63, %v1309_v21  ;;  %v1419_v63 = vunpack.c.h.bf16 %v4375_v18  ;;  %v4443_v21 = vld [vmem:[%s4765_s4 + $0x60] sm:$0xff] }
 0x15c   :  { %v1346_v1 = vrot.slane %v1211_v0, %v4128_v22  ;;  %v1319_v41 = vsel %vm1261_vm5, %v1318_v25, %v1314_v10  ;;  %v1420_v0 = vunpack.c.l.bf16 %v4380_v36  ;;  %v1438_v10 = vunpack.c.l.bf16 %v4428_v33 }
 0x15e   :  { %v1090_v7 = vpop.xlane.xlu0 %1089 }
 0x15f   :  { %v2713_v35 = vrot.slane %v1090_v7, %v4125_v34  ;;  %v1210_v28 = vmul.f32 2.0, %v1090_v7 }
 0x161   :  { %v2718_v44 = vsel %vm1247_vm3, %v2717_v3, %v2713_v35  ;;  %v1342_v12 = vrot.slane %v1210_v28, %v4125_v34  ;;  %v1328_v3 = vsel %vm1247_vm3, %v1327_v43, %v1323_v58  ;;  %v1359_v34 = vsel %vm1358_vm6, %v1281_v19, %v1262_v48  ;;  %v4423_v48 = vld [vmem:[%s4765_s4 + $0x90] sm:$0xff] }
 0x162   :  { %v1096_v37 = vpop.xlane.xlu1 %1095  ;;  %v1361_v11 = vsel %vm1360_vm7, %v1300_v26, %v1359_v34  ;;  %v1418_v43 = vunpack.c.l.bf16 %v4375_v18  ;;  %v1405_v28 = vunpack.c.h.bf16 %v4391_v5  ;;  %v1404_v58 = vunpack.c.l.bf16 %v4391_v5  ;;  %v4457_v26 = vld [vmem:[%s4765_s4 + $0x20] sm:$0xff] }
 0x163   :  { %v1212_v15 = vmul.f32 2.0, %v1096_v37  ;;  %v2722_v39 = vrot.slane %v1096_v37, %v4140_v8  ;;  %v1363_v17 = vsel %vm1362_vm8, %v1319_v41, %v1361_v11  ;;  %v4911_v19 = vmov 0.0  }
 0x164   :  { %v1424_v41 = vunpack.c.l.bf16 %v4443_v21  ;;  %v1408_v34 = vunpack.c.l.bf16 %v4457_v26 }
 0x165   :  { %v1087_v42 = vpop.xlane.xlu0 %1086  ;;  %v1351_v60 = vrot.slane %v1212_v15, %v4140_v8  ;;  %v1347_v8 = vsel %vm1247_vm3, %v1346_v1, %v1342_v12  ;;  %v4412_v15 = vld [vmem:[%s4765_s4 + $0xc8] sm:$0xff]  ;;  %v1437_v1 = vunpack.c.h.bf16 %v4423_v48  ;;  %v1439_v12 = vunpack.c.h.bf16 %v4428_v33 }
 0x166   :  { %v1209_v29 = vmul.f32 2.0, %v1087_v42  ;;  %v2708_v40 = vrot.slane %v1087_v42, %v4161_v30  ;;  %v1407_v42 = vunpack.c.h.bf16 %v4396_v13 }
 0x167   :  { %v1352_v57 = vsel %vm1254_vm4, %v1351_v60, %v1347_v8 }
 0x168   :  { %v1337_v53 = vrot.slane %v1209_v29, %v4161_v30  ;;  %v2709_v46 = vsel %vm1261_vm5, %v2708_v40, %v4259_v55  ;;  %v1333_v55 = vsel %vm1254_vm4, %v1332_v14, %v1328_v3  ;;  %v4417_v29 = vld [vmem:[%s4765_s4 + $0xd0] sm:$0xff]  ;;  %v1406_v40 = vunpack.c.l.bf16 %v4396_v13  ;;  %v4462_v3 = vld [vmem:[%s4765_s4 + $0x28] sm:$0xff] }
 0x169   :  { %v2732_v45 = vsel %vm1364_vm9, %v2709_v46, %v4267_v52  ;;  %v2723_v52 = vsel %vm1254_vm4, %v2722_v39, %v2718_v44  ;;  %v1451_v14 = vunpack.c.h.bf16 %v4412_v15  ;;  %v1453_v25 = vunpack.c.h.bf16 %v4417_v29  ;;  %v4438_v46 = vld [vmem:[%s4765_s4 + $0x58] sm:$0xff] }
 0x16a   :  { %v1099_v47 = vpop.xlane.xlu0 %1098  ;;  %v1338_v7 = vsel %vm1261_vm5, %v1337_v53, %v1333_v55  ;;  %v1450_v39 = vunpack.c.l.bf16 %v4412_v15  ;;  %v1452_v53 = vunpack.c.l.bf16 %v4417_v29  ;;  %v1423_v60 = vunpack.c.h.bf16 %v4438_v46 }
 0x16b   :  { %v1213_v50 = vmul.f32 2.0, %v1099_v47  ;;  %v2727_v22 = vrot.slane %v1099_v47, %v4161_v30  ;;  %v1365_v62 = vsel %vm1364_vm9, %v1338_v7, %v1363_v17  ;;  %v1425_v47 = vunpack.c.h.bf16 %v4443_v21 }
 0x16c   :  { %v1422_v55 = vunpack.c.l.bf16 %v4438_v46  ;;  %v1410_v7 = vunpack.c.l.bf16 %v4462_v3 }
 0x16d   :  { %v1356_v61 = vrot.slane %v1213_v50, %v4161_v30  ;;  %v2728_v35 = vsel %vm1261_vm5, %v2727_v22, %v2723_v52  ;;  %v4363_v30 = vld [vmem:[%s4765_s4 + $0x80] sm:$0xff]  ;;  %v1409_v50 = vunpack.c.h.bf16 %v4457_v26  ;;  %v1411_v22 = vunpack.c.h.bf16 %v4462_v3  ;;  %v4474_v52 = vld [vmem:[%s4765_s4 + $0xd8] sm:$0xff] }
 0x16e   :  { %v4354_v56 = vsel %vm1366_vm10, %v2728_v35, %v2732_v45  ;;  %v1433_v24 = vunpack.c.h.bf16 %v4363_v30  ;;  %v1432_v37 = vunpack.c.l.bf16 %v4363_v30  ;;  %v1436_v45 = vunpack.c.l.bf16 %v4423_v48 }
 0x16f   :  { %v1357_v2 = vsel %vm1261_vm5, %v1356_v61, %v1352_v57  ;;  %v1455_v11 = vunpack.c.h.bf16 %v4474_v52  ;;  %v1454_v8 = vunpack.c.l.bf16 %v4474_v52  ;;  %v4488_v61 = vld [vmem:[%s4765_s4 + $0x68] sm:$0xff]  ;;  %v4500_v57 = vld [vmem:[%s4765_s4 + $0x30] sm:$0xff] }
 0x170   :  { %v1367_v51 = vsel %vm1366_vm10, %v1357_v2, %v1365_v62  ;;  %v1427_v62 = vunpack.c.h.bf16 %v4488_v61  ;;  %v1413_v2 = vunpack.c.h.bf16 %v4500_v57 }
 0x171   :  { %v1369_v44 = vadd.f32 %v1367_v51, %v1189_v49  ;;  %v4480_v49 = vld [vmem:[%s4765_s4 + $0xa0] sm:$0xff]  ;;  %v1412_v51 = vunpack.c.l.bf16 %v4500_v57 }
 0x172   :  { %v1441_v35 = vunpack.c.h.bf16 %v4480_v49  ;;  %v1440_v17 = vunpack.c.l.bf16 %v4480_v49 }
 0x173   :  { %v4382_v23 = vsub.f32 %v1369_v44, %v1370_v20  ;;  %v1426_v20 = vunpack.c.l.bf16 %v4488_v61 }
 0x175   :  { %2822 = vmatmul.mubr.msk.f32.vlgmr.msra.gmra.mxu0 %vm1456_vm11, %v4382_v23  ;;  %2823 = vmatmul.mubr.msk.f32.vlgmr.msra.gmra.mxu1 %vm1456_vm11, %v4382_v23 }
 0x176   :  { %1627 = vmatpush1.msra.mxu0 %v1446_v38  ;;  %1698 = vmatpush1.msra.mxu1 %v1448_v59 }
 0x177   :  { %1628 = vmatprep.subr.mxu0 %v1433_v24  ;;  %1699 = vmatprep.subr.mxu1 %v1435_v54 }
 0x178   :  { %1629 = vmatpush1.msra.mxu0 %v1432_v37  ;;  %1700 = vmatpush1.msra.mxu1 %v1434_v9 }
 0x179   :  { %1630 = vmatprep.subr.mxu0 %v1419_v63  ;;  %1701 = vmatprep.subr.mxu1 %v1421_v6 }
 0x17a   :  { %1631 = vmatpush1.msra.mxu0 %v1418_v43  ;;  %1702 = vmatpush1.msra.mxu1 %v1420_v0 }
 0x17b   :  { %1632 = vmatprep.subr.mxu0 %v1405_v28  ;;  %1703 = vmatprep.subr.mxu1 %v1407_v42 }
 0x17c   :  { %1633 = vmatpush1.msra.mxu0 %v1404_v58  ;;  %1666 = vmatprep.mubr.f32.mxu0 %v4911_v19 }
 0x17d   :  { %1704 = vmatpush1.msra.mxu1 %v1406_v40  ;;  %1737 = vmatprep.mubr.f32.mxu1 %v4911_v19 }
 0x17e   :  { %2824 = vmatmul.mubr.msk.f32.vlgmr.msra.gmra.mxu0 %vm1456_vm11, %v4382_v23  ;;  %2825 = vmatmul.mubr.msk.f32.vlgmr.msra.gmra.mxu1 %vm1456_vm11, %v4382_v23 }
 0x17f   :  { %1768 = vmatprep.subr.mxu0 %v1451_v14  ;;  %1839 = vmatprep.subr.mxu1 %v1453_v25 }
 0x180   :  { %1769 = vmatpush1.msra.mxu0 %v1450_v39  ;;  %1840 = vmatpush1.msra.mxu1 %v1452_v53 }
 0x181   :  { %1770 = vmatprep.subr.mxu0 %v1437_v1  ;;  %1841 = vmatprep.subr.mxu1 %v1439_v12 }
 0x182   :  { %1771 = vmatpush1.msra.mxu0 %v1436_v45  ;;  %1842 = vmatpush1.msra.mxu1 %v1438_v10 }
 0x183   :  { %1772 = vmatprep.subr.mxu0 %v1423_v60  ;;  %1843 = vmatprep.subr.mxu1 %v1425_v47 }
 0x184   :  { %1773 = vmatpush1.msra.mxu0 %v1422_v55  ;;  %1844 = vmatpush1.msra.mxu1 %v1424_v41 }
 0x185   :  { %1774 = vmatprep.subr.mxu0 %v1409_v50  ;;  %1845 = vmatprep.subr.mxu1 %v1411_v22 }
 0x186   :  { %1775 = vmatpush1.msra.mxu0 %v1408_v34  ;;  %1808 = vmatprep.mubr.f32.mxu0 %v4911_v19 }
 0x187   :  { %1846 = vmatpush1.msra.mxu1 %v1410_v7  ;;  %1879 = vmatprep.mubr.f32.mxu1 %v4911_v19 }
 0x188   :  { %2826 = vmatmul.mubr.msk.f32.vlgmr.msra.gmra.mxu0 %vm1456_vm11, %v4382_v23  ;;  %2827 = vmatmul.mubr.msk.f32.vlgmr.msra.gmra.mxu1 %vm1456_vm11, %v4382_v23 }
 0x189   :  { %1910 = vmatprep.subr.mxu0 %v1455_v11  ;;  %1950 = vmatprep.mubr.f32.mxu0 %v4911_v19 }
 0x18a   :  { %1911 = vmatpush1.msra.mxu0 %v1454_v8 }
 0x18b   :  { %1912 = vmatprep.subr.mxu0 %v1441_v35 }
 0x18c   :  { %1913 = vmatpush1.msra.mxu0 %v1440_v17 }
 0x18d   :  { %1914 = vmatprep.subr.mxu0 %v1427_v62 }
 0x18e   :  { %1915 = vmatpush1.msra.mxu0 %v1426_v20 }
 0x18f   :  { %1916 = vmatprep.subr.mxu0 %v1413_v2 }
 0x190   :  { %1917 = vmatpush1.msra.mxu0 %v1412_v51 }
 0x191   :  { %2828 = vmatmul.mubr.msk.f32.vlgmr.msra.gmra.mxu0 %vm1456_vm11, %v4382_v23 }
 0x235   :  { %v4509_v44 = vpop.f32.mrf.mxu0  ;;  %v4511_v38 = vpop.f32.mrf.mxu1 }
 0x236   :  { %v1958_v40 = vsel %vm1957_vm12, %v4509_v44, inf  ;;  %v1960_v55 = vsel %vm1957_vm12, %v4511_v38, inf }
 0x237   :  { %v4513_v59 = vpop.f32.mrf.mxu0  ;;  %v4515_v24 = vpop.f32.mrf.mxu1 }
 0x238   :  { %v1959_v14 = vsel %vm1957_vm12, %v4513_v59, inf  ;;  %v1961_v25 = vsel %vm1957_vm12, %v4515_v24, inf }
 0x23e   :  { %v4517_v54 = vpop.f32.mrf.mxu0  ;;  %v4519_v37 = vpop.f32.mrf.mxu1 }
 0x23f   :  { %v1962_v28 = vsel %vm1957_vm12, %v4517_v54, inf  ;;  %v1966_v39 = vsel %vm1957_vm12, %v4519_v37, inf }
 0x240   :  { %v4521_v9 = vpop.f32.mrf.mxu0  ;;  %v4523_v63 = vpop.f32.mrf.mxu1  ;;  %v1963_v45 = vmin.f32 %v1958_v40, %v1962_v28  ;;  %v1967_v22 = vmin.f32 %v1960_v55, %v1966_v39 }
 0x241   :  { %v1964_v42 = vsel %vm1957_vm12, %v4521_v9, inf  ;;  %v1968_v58 = vsel %vm1957_vm12, %v4523_v63, inf }
 0x242   :  { %v1965_v10 = vmin.f32 %v1959_v14, %v1964_v42  ;;  %v1969_v60 = vmin.f32 %v1961_v25, %v1968_v58  ;;  %v4912_v42 = vld [vmem:[#allocation6_spill] sm:$0xff] }
 0x243   :  { %v4560_v58 = vadd.s32 128, %v4912_v42  ;;  %v4563_v40 = vadd.s32 256, %v4912_v42  ;;  %v4566_v14 = vadd.s32 384, %v4912_v42  ;;  %v4569_v25 = vadd.s32 512, %v4912_v42 }
 0x244   :  { %v4572_v39 = vadd.s32 640, %v4912_v42  ;;  %v4590_v55 = vadd.s32 1408, %v4912_v42 }
 0x248   :  { %v4525_v6 = vpop.f32.mrf.mxu0  ;;  %v4527_v43 = vpop.f32.mrf.mxu1 }
 0x249   :  { %v1970_v53 = vsel %vm1957_vm12, %v4525_v6, inf  ;;  %v1974_v41 = vsel %vm1957_vm12, %v4527_v43, inf }
 0x24a   :  { %v4529_v23 = vpop.f32.mrf.mxu0  ;;  %v4531_v0 = vpop.f32.mrf.mxu1  ;;  %v1971_v34 = vmin.f32 %v1963_v45, %v1970_v53  ;;  %v1975_v17 = vmin.f32 %v1967_v22, %v1974_v41  ;;  %v4575_v53 = vadd.s32 768, %v4912_v42  ;;  %v4584_v45 = vadd.s32 1152, %v4912_v42 }
 0x24b   :  { %v1972_v1 = vsel %vm1957_vm12, %v4529_v23, inf  ;;  %v1976_v12 = vsel %vm1957_vm12, %v4531_v0, inf  ;;  %v4593_v41 = vadd.s32 1536, %v4912_v42 }
 0x24c   :  { %v1973_v7 = vmin.f32 %v1965_v10, %v1972_v1  ;;  %v1977_v11 = vmin.f32 %v1969_v60, %v1976_v12  ;;  %v4578_v1 = vadd.s32 896, %v4912_v42  ;;  %v4581_v12 = vadd.s32 1024, %v4912_v42 }
 0x24d   :  { %v4587_v60 = vadd.s32 1280, %v4912_v42 }
 0x24e   :  { %v1984_v51 = vmin.f32 %v1975_v17, %v1977_v11 }
 0x251   :  { %v1952_v47 = vpop.f32.mrf.mxu0 }
 0x252   :  { %v1978_v50 = vsel %vm1957_vm12, %v1952_v47, inf }
 0x253   :  { %v1954_v8 = vpop.f32.mrf.mxu0  ;;  %v1979_v62 = vmin.f32 %v1971_v34, %v1978_v50  ;;  %v4596_v50 = vadd.s32 1664, %v4912_v42 }
 0x254   :  { %v1981_v35 = vsel %vm1980_vm13, %v1954_v8, inf }
 0x255   :  { %v1982_v20 = vmin.f32 %v1973_v7, %v1981_v35 }
 0x257   :  { %v1983_v2 = vmin.f32 %v1979_v62, %v1982_v20 }
 0x259   :  { %v1985_v28 = vmin.f32 %v1983_v2, %v1984_v51 }
 0x25b   :  { %1986 = vmin.xlane.f32.xlu1 %v1985_v28 }
 0x2e4   :  { %v1987_v10 = vpop.xlane.xlu1 %1986 }
 0x2e5   :  { %vm2001_vm15 = vcmp.le.f32.partialorder %v4509_v44, %v1987_v10  ;;  %vm2002_vm0 = vcmp.le.f32.partialorder %v4513_v59, %v1987_v10  ;;  %vm2003_vm1 = vcmp.le.f32.partialorder %v4511_v38, %v1987_v10  ;;  %vm2004_vm2 = vcmp.le.f32.partialorder %v4515_v24, %v1987_v10 }
 0x2e6   :  { %vm2005_vm3 = vcmp.le.f32.partialorder %v4517_v54, %v1987_v10  ;;  %vm2006_vm4 = vcmp.le.f32.partialorder %v4521_v9, %v1987_v10  ;;  %vm2007_vm5 = vcmp.le.f32.partialorder %v4519_v37, %v1987_v10  ;;  %vm2008_vm6 = vcmp.le.f32.partialorder %v4523_v63, %v1987_v10 }
 0x2e7   :  { %vm2009_vm7 = vcmp.le.f32.partialorder %v4525_v6, %v1987_v10  ;;  %vm2010_vm8 = vcmp.le.f32.partialorder %v4529_v23, %v1987_v10  ;;  %vm2011_vm9 = vcmp.le.f32.partialorder %v4527_v43, %v1987_v10  ;;  %vm2012_vm10 = vcmp.le.f32.partialorder %v4531_v0, %v1987_v10 }
 0x2e8   :  { %vm2013_vm11 = vcmp.le.f32.partialorder %v1952_v47, %v1987_v10  ;;  %vm2014_vm14 = vcmp.le.f32.partialorder %v1954_v8, %v1987_v10  ;;  %v2015_v44 = vsel %vm2001_vm15, %v4912_v42, 1680  ;;  %v2016_v38 = vsel %vm2002_vm0, %v4560_v58, 1680 }
 0x2e9   :  { %v2017_v59 = vsel %vm2003_vm1, %v4563_v40, 1680  ;;  %v2018_v24 = vsel %vm2004_vm2, %v4566_v14, 1680  ;;  %v2019_v54 = vsel %vm2005_vm3, %v4569_v25, 1680  ;;  %v2020_v37 = vsel %vm2006_vm4, %v4572_v39, 1680 }
 0x2ea   :  { %v2021_v9 = vsel %vm2007_vm5, %v4575_v53, 1680  ;;  %v2022_v63 = vsel %vm2008_vm6, %v4578_v1, 1680  ;;  %v2023_v6 = vsel %vm2009_vm7, %v4581_v12, 1680  ;;  %v2024_v43 = vsel %vm2010_vm8, %v4584_v45, 1680 }
 0x2eb   :  { %v2025_v23 = vsel %vm2011_vm9, %v4587_v60, 1680  ;;  %v2026_v0 = vsel %vm2012_vm10, %v4590_v55, 1680  ;;  %v2027_v47 = vsel %vm2013_vm11, %v4593_v41, 1680  ;;  %v2028_v22 = vsel %vm2014_vm14, %v4596_v50, 1680 }
 0x2ec   :  { %v2029_v34 = vsel %vm1957_vm12, %v2015_v44, 2147483647  ;;  %v2030_v7 = vsel %vm1957_vm12, %v2016_v38, 2147483647  ;;  %v2031_v11 = vsel %vm1957_vm12, %v2017_v59, 2147483647 }
 0x2ed   :  { %v2032_v8 = vsel %vm1957_vm12, %v2018_v24, 2147483647  ;;  %v2033_v35 = vsel %vm1957_vm12, %v2019_v54, 2147483647  ;;  %v2036_v17 = vsel %vm1957_vm12, %v2020_v37, 2147483647 }
 0x2ee   :  { %vm2034_vm15 = vcmp.lt.s32.totalorder %v2029_v34, %v2033_v35  ;;  %vm2037_vm0 = vcmp.lt.s32.totalorder %v2030_v7, %v2036_v17  ;;  %v2039_v62 = vsel %vm1957_vm12, %v2021_v9, 2147483647  ;;  %v2042_v20 = vsel %vm1957_vm12, %v2022_v63, 2147483647 }
 0x2ef   :  { %v2035_v2 = vsel %vm2034_vm15, %v2029_v34, %v2033_v35  ;;  %v2038_v51 = vsel %vm2037_vm0, %v2030_v7, %v2036_v17  ;;  %vm2040_vm14 = vcmp.lt.s32.totalorder %v2031_v11, %v2039_v62  ;;  %vm2043_vm1 = vcmp.lt.s32.totalorder %v2032_v8, %v2042_v20  ;;  %v4913_v17 = vld [vmem:[#allocation12_spill] sm:$0xff] }
 0x2f0   :  { %v2041_v28 = vsel %vm2040_vm14, %v2031_v11, %v2039_v62  ;;  %v2044_v10 = vsel %vm2043_vm1, %v2032_v8, %v2042_v20  ;;  %v2045_v44 = vsel %vm1957_vm12, %v2023_v6, 2147483647  ;;  %v2048_v38 = vsel %vm1957_vm12, %v2024_v43, 2147483647  ;;  %v4914_v62 = vld [vmem:[#allocation14_spill] sm:$0xff] }
 0x2f1   :  { %vm2046_vm2 = vcmp.lt.s32.totalorder %v2035_v2, %v2045_v44  ;;  %vm2049_vm3 = vcmp.lt.s32.totalorder %v2038_v51, %v2048_v38  ;;  %v2051_v59 = vsel %vm1957_vm12, %v2025_v23, 2147483647  ;;  %v2054_v24 = vsel %vm1957_vm12, %v2026_v0, 2147483647 }
 0x2f2   :  { %v2047_v54 = vsel %vm2046_vm2, %v2035_v2, %v2045_v44  ;;  %v2050_v37 = vsel %vm2049_vm3, %v2038_v51, %v2048_v38  ;;  %vm2052_vm4 = vcmp.lt.s32.totalorder %v2041_v28, %v2051_v59  ;;  %vm2055_vm5 = vcmp.lt.s32.totalorder %v2044_v10, %v2054_v24  ;;  %v4915_v2 = vld [vmem:[#allocation15_spill] sm:$0xff] }
 0x2f3   :  { %v2053_v9 = vsel %vm2052_vm4, %v2041_v28, %v2051_v59  ;;  %v2056_v63 = vsel %vm2055_vm5, %v2044_v10, %v2054_v24  ;;  %v2057_v34 = vsel %vm1957_vm12, %v2027_v47, 2147483647  ;;  %v2060_v7 = vsel %vm1980_vm13, %v2028_v22, 2147483647  ;;  %v4916_v47 = vld [vmem:[#allocation11_spill] sm:$0xff]  ;;  %v4917_v10 = vld [vmem:[#allocation17_spill] sm:$0xff] }
 0x2f4   :  { %vm2058_vm6 = vcmp.lt.s32.totalorder %v2047_v54, %v2057_v34  ;;  %vm2061_vm7 = vcmp.lt.s32.totalorder %v2050_v37, %v2060_v7  ;;  %vm2065_vm8 = vcmp.lt.s32.totalorder %v2053_v9, %v2056_v63  ;;  %v2858_v20 = vcombine.high %v4914_v62, %v4913_v17  ;;  %v4918_v44 = vld [vmem:[#allocation19_spill] sm:$0xff]  ;;  %v4919_v59 = vld [vmem:[#allocation18_spill] sm:$0xff]  ;;  %v4920_v24 = vld [vmem:[#allocation20_spill] sm:$0xff] }
 0x2f5   :  { %v2059_v6 = vsel %vm2058_vm6, %v2047_v54, %v2057_v34  ;;  %v2062_v43 = vsel %vm2061_vm7, %v2050_v37, %v2060_v7  ;;  %v2066_v23 = vsel %vm2065_vm8, %v2053_v9, %v2056_v63  ;;  %v2860_v51 = vcombine.high %v4916_v47, %v4915_v2 }
 0x2f6   :  { %vm2063_vm9 = vcmp.lt.s32.totalorder %v2059_v6, %v2062_v43  ;;  %v2857_v22 = vcombine.low %v4914_v62, %v4913_v17  ;;  %v2859_v28 = vcombine.low %v4916_v47, %v4915_v2  ;;  %v2844_v38 = vcombine.high %v4918_v44, %v4917_v10  ;;  %2299 = vmatprep.subr.bf16.mxu1 %v2858_v20 }
 0x2f7   :  { %v2064_v11 = vsel %vm2063_vm9, %v2059_v6, %v2062_v43  ;;  %v2846_v54 = vcombine.high %v4920_v24, %v4919_v59  ;;  %2339 = vmatprep.subr.bf16.mxu0 %v2860_v51  ;;  %v2843_v37 = vcombine.low %v4918_v44, %v4917_v10  ;;  %v2845_v9 = vcombine.low %v4920_v24, %v4919_v59 }
 0x2f8   :  { %vm2067_vm10 = vcmp.lt.s32.totalorder %v2064_v11, %v2066_v23  ;;  %2300 = vmatpush1.bf16.xpose.msra.mxu1 %v2857_v22  ;;  %2340 = vmatpush1.bf16.xpose.msra.mxu0 %v2859_v28  ;;  %v2862_v43 = vcombine.high %v4363_v30, %v4909_v16 }
 0x2f9   :  { %v2068_v0 = vsel %vm2067_vm10, %v2064_v11, %v2066_v23  ;;  %2301 = vmatprep.subr.bf16.mxu1 %v2844_v38  ;;  %2341 = vmatprep.subr.bf16.mxu0 %v2846_v54  ;;  %v2864_v11 = vcombine.high %v4368_v4, %v4910_v32  ;;  %v2861_v32 = vcombine.low %v4363_v30, %v4909_v16 }
 0x2fa   :  { %v2070_v8 = vshra.s32 %v2068_v0, 16  ;;  %v2069_v63 = vand.u32 65535, %v2068_v0  ;;  %v3151_v0 = vmov 1.0|1.0   ;;  %v2848_v30 = vcombine.high %v4391_v5, %v4375_v18 }
 0x2fb   :  { %v2850_v16 = vcombine.high %v4396_v13, %v4380_v36 }
 0x2fc   :  { %v2072_v35 = vcvt.s32.f32 %v2070_v8  ;;  %v2071_v7 = vcvt.s32.f32 %v2069_v63 }
 0x2fe   :  { %2073 = vmin.xlane.f32.xlu0 %v2072_v35 }
 0x300   :  { %2302 = vmatpush1.bf16.xpose.msra.mxu1 %v2843_v37  ;;  %2342 = vmatpush1.bf16.xpose.msra.mxu0 %v2845_v9 }
 0x301   :  { %2379 = vmatprep.subr.bf16.mxu1 %v2862_v43  ;;  %2419 = vmatprep.subr.bf16.mxu0 %v2864_v11 }
 0x387   :  { %v2074_v34 = vpop.xlane.xlu0 %2073 }
 0x388   :  { %vm2075_vm12 = vcmp.eq.f32.partialorder %v2072_v35, %v2074_v34  ;;  %v2080_v23 = vcvt.f32.s32 %v2074_v34 }
 0x389   :  { %v2076_v6 = vsel %vm2075_vm12, %v2071_v7, inf }
 0x38a   :  { %2077 = vmin.xlane.f32.xlu1 %v2076_v6  ;;  %v2081_v17 = vshll.u32 %v2080_v23, 16 }
 0x413   :  { %v2078_v8 = vpop.xlane.xlu1 %2077 }
 0x414   :  { %v2079_v62 = vcvt.f32.s32 %v2078_v8 }
 0x416   :  { %v4658_v20 = vadd.s32 %v2081_v17, %v2079_v62 }
 0x418   :  { %vm2084_vm13 = vcmp.eq.s32.totalorder %v4560_v58, %v4658_v20  ;;  %vm2086_vm11 = vcmp.eq.s32.totalorder %v4566_v14, %v4658_v20  ;;  %vm2083_vm15 = vcmp.eq.s32.totalorder %v4912_v42, %v4658_v20  ;;  %vm2085_vm14 = vcmp.eq.s32.totalorder %v4563_v40, %v4658_v20  ;;  %v3135_v58 = vld [vmem:[%s4765_s4 + $0xc0] sm:$0xff] }
 0x419   :  { %vm2871_vm0 = vmpackc.low %vm2084_vm13, %vm2084_vm13  ;;  %v2863_v14 = vcombine.low %v4368_v4, %v3135_v58  ;;  %vm2088_vm2 = vcmp.eq.s32.totalorder %v4572_v39, %v4658_v20  ;;  %vm2090_vm4 = vcmp.eq.s32.totalorder %v4578_v1, %v4658_v20  ;;  %v2847_v4 = vcombine.low %v4391_v5, %v4375_v18  ;;  %v4925_v1 = vld [vmem:[#allocation10_spill] sm:$0xff] }
 0x41a   :  { %2872 = vmatprep.mubr.msk.bf16.mxu1 %vm2871_vm0, %v3151_v0  ;;  %vm2875_vm1 = vmpackc.low %vm2086_vm11, %vm2086_vm11  ;;  %v2849_v42 = vcombine.low %v4396_v13, %v4380_v36  ;;  %v2866_v40 = vcombine.high %v4423_v48, %v4412_v15  ;;  %v2868_v39 = vcombine.high %v4428_v33, %v4417_v29  ;;  %vm2087_vm8 = vcmp.eq.s32.totalorder %v4569_v25, %v4658_v20 }
 0x41b   :  { %2876 = vmatprep.mubr.msk.bf16.mxu0 %vm2875_vm1, %v3151_v0  ;;  %vm2873_vm3 = vmpackc.low %vm2083_vm15, %vm2083_vm15  ;;  %vm2089_vm9 = vcmp.eq.s32.totalorder %v4575_v53, %v4658_v20  ;;  %v2865_v18 = vcombine.low %v4423_v48, %v4412_v15  ;;  %vm2092_vm10 = vcmp.eq.s32.totalorder %v4584_v45, %v4658_v20  ;;  %v2867_v36 = vcombine.low %v4428_v33, %v4417_v29  ;;  %v4927_v45 = vld [vmem:[#allocation16_spill] sm:$0xff] }
 0x41c   :  { %2874 = vmatmul.mubr.msk.bf16.vlgmr.msra.gmra.mxu1 %vm2873_vm3, %v3151_v0  ;;  %vm2877_vm5 = vmpackc.low %vm2085_vm14, %vm2085_vm14  ;;  %vm2094_vm13 = vcmp.eq.s32.totalorder %v4590_v55, %v4658_v20  ;;  %v2852_v5 = vcombine.high %v4457_v26, %v4438_v46  ;;  %v2854_v13 = vcombine.high %v4462_v3, %v4443_v21  ;;  %v2851_v15 = vcombine.low %v4457_v26, %v4438_v46 }
 0x41d   :  { %2878 = vmatmul.mubr.msk.bf16.vlgmr.msra.gmra.mxu0 %vm2877_vm5, %v3151_v0  ;;  %2380 = vmatpush1.bf16.xpose.msra.mxu1 %v2861_v32  ;;  %vm2879_vm6 = vmpackc.low %vm2088_vm2, %vm2088_vm2  ;;  %v2853_v29 = vcombine.low %v4462_v3, %v4443_v21  ;;  %v2870_v48 = vcombine.high %v4480_v49, %v4474_v52  ;;  %vm2277_vm14 = vcmask 130048   ;;  %vm2096_vm1 = vcmp.eq.s32.totalorder %v4596_v50, %v4658_v20  ;;  %v4931_v50 = vld [vmem:[#allocation13_spill] sm:$0xff] }
 0x41e   :  { %2420 = vmatpush1.bf16.xpose.msra.mxu0 %v2863_v14  ;;  %2880 = vmatprep.mubr.msk.bf16.mxu1 %vm2879_vm6, %v3151_v0  ;;  %vm2883_vm7 = vmpackc.low %vm2090_vm4, %vm2090_vm4  ;;  %vm2091_vm2 = vcmp.eq.s32.totalorder %v4581_v12, %v4658_v20  ;;  %vm2093_vm3 = vcmp.eq.s32.totalorder %v4587_v60, %v4658_v20  ;;  %v2869_v33 = vcombine.low %v4480_v49, %v4474_v52  ;;  %v2842_v46 = vsel %vm2096_vm1, 1.0, %v4911_v19  ;;  %v4921_v19 = vld [vmem:[#allocation7_spill] sm:$0xff]  ;;  %v4923_v49 = vld [vmem:[#allocation8_spill] sm:$0xff] }
 0x41f   :  { %2884 = vmatprep.mubr.msk.bf16.mxu0 %vm2883_vm7, %v3151_v0  ;;  %2381 = vmatprep.subr.bf16.mxu1 %v2848_v30  ;;  %vm2881_vm12 = vmpackc.low %vm2087_vm8, %vm2087_vm8  ;;  %v2856_v21 = vcombine.high %v4500_v57, %v4488_v61  ;;  %v2138_v26 = vpack.c.bf16 %v2842_v46, %v2842_v46  ;;  %v2855_v3 = vcombine.low %v4500_v57, %v4488_v61  ;;  %vm4922_vm8 = vcmask 72704   ;;  %v4929_v60 = vld [vmem:[#allocation9_spill] sm:$0xff] }
 0x420   :  { %2421 = vmatprep.subr.bf16.mxu0 %v2850_v16  ;;  %vm2885_vm11 = vmpackc.low %vm2089_vm9, %vm2089_vm9  ;;  %vm2095_vm6 = vcmp.eq.s32.totalorder %v4593_v41, %v4658_v20  ;;  %v1100_v52 = vsel %vm4922_vm8, %v4921_v19, 0.0 }
 0x421   :  { %vm2887_vm15 = vmpackc.low %vm2092_vm10, %vm2092_vm10 }
 0x422   :  { %vm2891_vm0 = vmpackc.low %vm2094_vm13, %vm2094_vm13 }
 0x423   :  { %vm2889_vm4 = vmpackc.low %vm2091_vm2, %vm2091_vm2 }
 0x424   :  { %vm2893_vm5 = vmpackc.low %vm2093_vm3, %vm2093_vm3 }
 0x425   :  { %2382 = vmatpush1.bf16.xpose.msra.mxu1 %v2847_v4  ;;  %vm2898_vm7 = vmpackc.low %vm2095_vm6, %vm2095_vm6 }
 0x426   :  { %2422 = vmatpush1.bf16.xpose.msra.mxu0 %v2849_v42  ;;  %2459 = vmatprep.subr.bf16.mxu1 %v2866_v40  ;;  %vm4924_vm9 = vmmov %vm4922_vm8  ;;  %v2579_v42 = vsub.f32 1.0, %v4288_v31 }
 0x427   :  { %2499 = vmatprep.subr.bf16.mxu0 %v2868_v39  ;;  %v1101_v25 = vsel %vm4924_vm9, %v4923_v49, 0.0  ;;  %vm4926_vm10 = vmmov %vm4922_vm8 }
 0x428   :  { %v1102_v53 = vadd.f32 %v1101_v25, %v1100_v52  ;;  %v1103_v12 = vsel %vm4926_vm10, %v4925_v1, 0.0  ;;  %vm4930_vm13 = vmmov %vm4922_vm8 }
 0x429   :  { %v1107_v55 = vsel %vm4930_vm13, %v4929_v60, 0.0 }
 0x42a   :  { %v1104_v57 = vadd.f32 %v1103_v12, %v1102_v53 }
 0x42c   :  { %2882 = vmatmul.mubr.msk.bf16.vlgmr.msra.gmra.mxu1 %vm2881_vm12, %v3151_v0  ;;  %vm4928_vm12 = vmmov %vm4922_vm8 }
 0x42d   :  { %2886 = vmatmul.mubr.msk.bf16.vlgmr.msra.gmra.mxu0 %vm2885_vm11, %v3151_v0  ;;  %2460 = vmatpush1.bf16.xpose.msra.mxu1 %v2865_v18  ;;  %v1105_v61 = vsel %vm4928_vm12, %v4927_v45, 0.0  ;;  %vm4932_vm11 = vmmov %vm4922_vm8 }
 0x42e   :  { %2888 = vmatprep.mubr.msk.bf16.mxu1 %vm2887_vm15, %v3151_v0  ;;  %2500 = vmatpush1.bf16.xpose.msra.mxu0 %v2867_v36  ;;  %v1106_v41 = vadd.f32 %v1105_v61, %v1104_v57  ;;  %v1109_v35 = vsel %vm4932_vm11, %v4931_v50, 0.0  ;;  %vm2568_vm15 = vcmask 259072  }
 0x42f   :  { %2892 = vmatprep.mubr.msk.bf16.mxu0 %vm2891_vm0, %v3151_v0  ;;  %2461 = vmatprep.subr.bf16.mxu1 %v2852_v5 }
 0x430   :  { %2501 = vmatprep.subr.bf16.mxu0 %v2854_v13  ;;  %v1108_v2 = vadd.f32 %v1107_v55, %v1106_v41 }
 0x432   :  { %v1110_v47 = vadd.f32 %v1109_v35, %v1108_v2 }
 0x434   :  { %1111 = vadd.xlane.f32.xlu0 %v1110_v47 }
 0x435   :  { %2462 = vmatpush1.bf16.xpose.msra.mxu1 %v2851_v15 }
 0x436   :  { %2502 = vmatpush1.bf16.xpose.msra.mxu0 %v2853_v29  ;;  %2895 = vmatprep.subr.msk.bf16.mxu1 %vm2277_vm14, %v2870_v48 }
 0x43c   :  { %2890 = vmatmul.mubr.msk.bf16.vlgmr.msra.gmra.mxu1 %vm2889_vm4, %v3151_v0 }
 0x43d   :  { %2894 = vmatmul.mubr.msk.bf16.vlgmr.msra.gmra.mxu0 %vm2893_vm5, %v3151_v0  ;;  %2540 = vmatpush1.bf16.xpose.msra.mxu1 %v2869_v33 }
 0x43e   :  { %2897 = vmatprep.mubr.msk.bf16.mxu1 %vm2277_vm14, %v2138_v26  ;;  %2896 = vmatprep.subr.msk.bf16.mxu1 %vm2277_vm14, %v2856_v21 }
 0x445   :  { %2542 = vmatpush1.bf16.xpose.msra.mxu1 %v2855_v3 }
 0x44c   :  { %2899 = vmatmul.mubr.msk.bf16.vlgmr.msra.gmra.mxu1 %vm2898_vm7, %v3151_v0 }
 0x4bd   :  { %v1112_v21 = vpop.xlane.xlu0 %1111 }
 0x4be   :  { %v1113_v26 = vrot.slane %v1112_v21, 4 }
 0x4c0   :  { %v1114_v31 = vadd.f32 %v1113_v26, %v1112_v21 }
 0x4c2   :  { %v1115_v3 = vrot.slane %v1114_v31, 2 }
 0x4c4   :  { %v1116_v19 = vadd.f32 %v1115_v3, %v1114_v31 }
 0x4c6   :  { %v1117_v52 = vrot.slane %v1116_v19, 1 }
 0x4c8   :  { %v1118_v49 = vadd.f32 %v1117_v52, %v1116_v19 }
 0x4ca   :  { %2900 = vpush %v1118_v49 }
 0x4dc   :  { %v2321_v51 = vpop.f32.mrf.mxu1 }
 0x4dd   :  { %v2361_v22 = vpop.f32.mrf.mxu0 }
 0x4de   :  { %v2323_v28 = vpop.f32.mrf.mxu1  ;;  %v2362_v17 = vadd.f32 %v2361_v22, %v2321_v51 }
 0x4df   :  { %v2363_v10 = vpop.f32.mrf.mxu0 }
 0x4e0   :  { %v2324_v44 = vpop.f32.mrf.mxu1 }
 0x4e1   :  { %v2364_v38 = vpop.f32.mrf.mxu0 }
 0x4e2   :  { %v2325_v59 = vpop.f32.mrf.mxu1 }
 0x4e3   :  { %v2365_v24 = vpop.f32.mrf.mxu0 }
 0x4ec   :  { %v2401_v54 = vpop.f32.mrf.mxu1 }
 0x4ed   :  { %v2441_v37 = vpop.f32.mrf.mxu0  ;;  %v2402_v32 = vadd.f32 %v2401_v54, %v2362_v17 }
 0x4ee   :  { %v2403_v9 = vpop.f32.mrf.mxu1 }
 0x4ef   :  { %v2443_v63 = vpop.f32.mrf.mxu0  ;;  %v2442_v30 = vadd.f32 %v2441_v37, %v2402_v32 }
 0x4f0   :  { %v2404_v34 = vpop.f32.mrf.mxu1 }
 0x4f1   :  { %v2444_v7 = vpop.f32.mrf.mxu0 }
 0x4f2   :  { %v2405_v6 = vpop.f32.mrf.mxu1 }
 0x4f3   :  { %v2445_v43 = vpop.f32.mrf.mxu0 }
 0x4fb   :  { %s2901_s4 = spop %2900 }
 0x4fc   :  { %v2481_v11 = vpop.f32.mrf.mxu1 }
 0x4fd   :  { %v2521_v23 = vpop.f32.mrf.mxu0  ;;  %v2482_v16 = vadd.f32 %v2481_v11, %v2442_v30 }
 0x4fe   :  { %v2483_v8 = vpop.f32.mrf.mxu1 }
 0x4ff   :  { %v2523_v62 = vpop.f32.mrf.mxu0  ;;  %v2522_v4 = vadd.f32 %v2521_v23, %v2482_v16 }
 0x500   :  { %v2484_v20 = vpop.f32.mrf.mxu1 }
 0x501   :  { %v2524_v0 = vpop.f32.mrf.mxu0 }
 0x502   :  { %v2485_v58 = vpop.f32.mrf.mxu1 }
 0x503   :  { %v2525_v14 = vpop.f32.mrf.mxu0 }
 0x50c   :  { %v2561_v40 = vpop.f32.mrf.mxu1 }
 0x50d   :  { %v2562_v39 = vadd.f32 %v2561_v40, %v2522_v4 }
 0x50e   :  { %v2563_v18 = vpop.f32.mrf.mxu1 }
 0x50f   :  { %v2580_v36 = vmul.f32 %v2579_v42, %v2562_v39  ;;  %v2567_v5 = vmul.f32 %v2562_v39, %v4283_v27  ;;  %v2735_v48 = vmul.f32 %v4354_v56, %v2562_v39 }
 0x510   :  { %v2564_v13 = vpop.f32.mrf.mxu1 }
 0x511   :  { %v2581_v15 = vsel %vm2568_vm15, %v2580_v36, 0.0  ;;  %v2569_v29 = vsel %vm2568_vm15, %v2567_v5, 0.0  ;;  %v2736_v46 = vsel %vm2568_vm15, %v2735_v48, 0.0 }
 0x512   :  { %v2565_v33 = vpop.f32.mrf.mxu1  ;;  %2582 = vadd.xlane.f32.xlu0 %v2581_v15  ;;  %2570 = vadd.xlane.f32.xlu1 %v2569_v29 }
 0x516   :  { %2737 = vadd.xlane.f32.xlu1 %v2736_v46 }
 0x59b   :  { %v2583_v25 = vpop.xlane.xlu0 %2582  ;;  %v2571_v27 = vpop.xlane.xlu1 %2570 }
 0x59c   :  { %v2584_v53 = vrot.slane %v2583_v25, 4  ;;  %v2572_v1 = vrot.slane %v2571_v27, 4 }
 0x59e   :  { %v2585_v12 = vadd.f32 %v2584_v53, %v2583_v25  ;;  %v2573_v45 = vadd.f32 %v2572_v1, %v2571_v27 }
 0x59f   :  { %v2738_v56 = vpop.xlane.xlu1 %2737 }
 0x5a0   :  { %v2586_v61 = vrot.slane %v2585_v12, 2  ;;  %v2574_v57 = vrot.slane %v2573_v45, 2  ;;  %v2739_v60 = vrot.slane %v2738_v56, 4 }
 0x5a2   :  { %v2587_v55 = vadd.f32 %v2586_v61, %v2585_v12  ;;  %v2740_v41 = vadd.f32 %v2739_v60, %v2738_v56  ;;  %v2575_v50 = vadd.f32 %v2574_v57, %v2573_v45 }
 0x5a4   :  { %v2741_v35 = vrot.slane %v2740_v41, 2  ;;  %v2576_v2 = vrot.slane %v2575_v50, 1  ;;  %v2588_v47 = vrot.slane %v2587_v55, 1 }
 0x5a6   :  { %v2742_v51 = vadd.f32 %v2741_v35, %v2740_v41  ;;  %v2577_v22 = vadd.f32 %v2576_v2, %v2575_v50  ;;  %v2589_v28 = vadd.f32 %v2588_v47, %v2587_v55 }
 0x5a8   :  { %2902 = vpush %v2577_v22  ;;  %v2743_v10 = vrot.slane %v2742_v51, 1 }
 0x5a9   :  { %2904 = vpush %v2589_v28 }
 0x5aa   :  { %v2744_v44 = vadd.f32 %v2743_v10, %v2742_v51 }
 0x5ac   :  { %2906 = vpush %v2744_v44 }
 0x5d9   :  { %s2903_s30 = spop %2902 }
 0x5da   :  { %2750 = sst [smem:[#allocation2 + $0x1]] %s2903_s30  ;;  %s2905_s6 = spop %2904 }
 0x5db   :  { %2752 = sst [smem:[#allocation2 + $0x2]] %s2905_s6 }
 0x5dd   :  { %s2907_s10 = spop %2906 }
 0x5de   :  { %s2746_s11 = sadd.f32 %s2907_s10, %s2901_s4 }
 0x5e0   :  { %2748 = sst [smem:[#allocation2]] %s2746_s11 }
 0x5e1   :  { %3147 = shalt.err (!%p3144_p4)
}
 0x5e2   :  { %s3152_s13 = smov [#allocation2]  }
 0x5e3   :  { %2762 = dma.smem_to_vmem %s3152_s13, 16, %s2760_s9, [#allocation3]  }
 0x5e4   :  { %3148 = dma.done.wait [#allocation3], 16  }
 0x5e5   :  { %3149 = vsyncadd [#allocation3], 4294967280 }
 0x5e6   :  { %2766 = sfence }
 0x5e7   :  { %2767 = vsyncpa [#allocation3], 1 }

</bundles_post_ra>
